<compile_context>
chip_gen: v7x
topology: tpu7x:2x2x1
jax: 0.10.0
libtpu: 0.0.40
codegen_flags: <defaults>
</compile_context>

<pallas_src>
import functools

import numpy as np
import jax
import jax.numpy as jnp
from jax import lax
from jax.experimental import pallas as pl
from jax.experimental.pallas import tpu as pltpu


def _round_up(x, m):
    return ((x + m - 1) // m) * m


def _conv_bn_act_kernel(x_ref, w_ref, shift_ref, slope_ref, o_ref, *, K, Wp, Cin):
    """Implicit-GEMM conv + folded-BN shift + (P)ReLU for one output tile.

    x_ref:     (1, 1, B, Cin)   flattened padded input row band (compute dtype)
    w_ref:     (K*K*Cin, tn)    BN-scale-folded weights (compute dtype)
    shift_ref: (1, tn)          per-output-channel shift, f32
    slope_ref: (1, tn)          negative slope (0 = ReLU, a = PReLU, 1 = none), f32
    o_ref:     (1, tm, tn)      output tile, f32
    """
    tm = o_ref.shape[1]
    w = w_ref[...]                              # (K*K*Cin, tn)
    # Unpack the band to f32 once so the K*K unaligned row slices below stay in
    # 32-bit layouts; each slice is packed back to the MXU dtype right before
    # the dot (no-ops when compute dtype is f32).
    x = x_ref[0, 0].astype(jnp.float32)         # (B, Cin)

    acc = None
    for kh in range(K):
        for kw in range(K):
            off = kh * Wp + kw                  # static shift into the band
            xs = x[off:off + tm, :].astype(w.dtype)              # (tm, Cin)
            wk = w[(kh * K + kw) * Cin:(kh * K + kw + 1) * Cin, :]  # (Cin, tn)
            d = jnp.dot(xs, wk, preferred_element_type=jnp.float32)
            acc = d if acc is None else acc + d

    y = acc + shift_ref[...]                    # (tm, tn) f32
    y = jnp.maximum(y, 0.0) + slope_ref[...] * jnp.minimum(y, 0.0)
    o_ref[0] = y.astype(o_ref.dtype)


def conv2d_block(x, weight, bias, gamma, beta, running_mean, running_var, *,
                 stride=1, same_padding=True, bn=True, nl='relu',
                 prelu_weight=None, eps=1e-5, tm=512, tn=256,
                 compute_dtype=jnp.bfloat16):
    """Forward of HRANet's Conv2d block. x: (N,Cin,H,W) f32 -> (N,Cout,Ho,Wo) f32."""
    N, Cin, H, W = x.shape
    Cout, _, K, Kw = weight.shape
    assert K == Kw, "square kernels only"
    pad = (K - 1) // 2 if same_padding else 0   # matches the PyTorch module

    # ---- host-side layout (O(input) bytes): NCHW -> NHWC, zero-pad, flatten ----
    # Cin rides the lane axis inside the kernel; one extra zero row at the
    # bottom keeps every shifted flat slice in bounds.
    x_nhwc = jnp.transpose(x, (0, 2, 3, 1)).astype(compute_dtype)
    Hp, Wp = H + 2 * pad, W + 2 * pad
    x_padded = jnp.pad(x_nhwc, ((0, 0), (pad, pad + 1), (pad, pad), (0, 0)))
    R = (Hp + 1) * Wp
    x_flat = x_padded.reshape(N, R, Cin)

    # Stride-1 output geometry; stride > 1 is handled by subsampling at the end
    # (HRANet convs are stride 1, so the extra compute is not paid in practice).
    Ho1, Wo1 = Hp - K + 1, Wp - K + 1
    M2 = Ho1 * Wp                  # flat output rows (incl. Wp-Wo1 throwaway cols)
    Kdim = K * K * Cin

    # ---- tiling: lane-dense Cout, large row tiles, VMEM-budget clamp ----
    Cout_pad = _round_up(Cout, 128)
    if Cout_pad % tn != 0:
        tn = 128
    tn = min(tn, Cout_pad)

    tm = _round_up(min(tm, _round_up(M2, 8)), 8)
    in_bytes = jnp.dtype(compute_dtype).itemsize

    def _vmem_est(tm_):
        band = tm_ + (K - 1) * (Wp + 1)
        return (2 * (band * Cin * in_bytes        # input band (double buffered)
                     + Kdim * tn * in_bytes       # weight tile
                     + tm_ * tn * 4               # f32 output tile
                     + 2 * tn * 4)                # shift + slope
                + band * Cin * 4)                 # in-kernel f32 copy of the band

    vmem_budget = 24 * 2**20                      # fits every generation's scope
    while _vmem_est(tm) > vmem_budget and tm > 64:
        tm //= 2
    tm = max(8, (tm // 8) * 8)

    M2p = _round_up(M2, tm)
    n_t = M2p // tm
    n_j = Cout_pad // tn
    B = tm + (K - 1) * (Wp + 1)

    # ---- overlapping input row bands (tiny duplication, not K*K im2col) ----
    starts = np.arange(n_t, dtype=np.int32) * tm
    row_idx = np.minimum(starts[:, None] + np.arange(B, dtype=np.int32)[None, :],
                         R - 1)
    x_bands = jnp.take(x_flat, jnp.asarray(row_idx), axis=1)   # (N, n_t, B, Cin)

    # ---- fold conv bias + eval-mode BN into weight scale / per-channel shift ----
    if bias is None:
        bias = jnp.zeros((Cout,), jnp.float32)
    if bn:
        s = gamma / jnp.sqrt(running_var + eps)
        shift = (bias - running_mean) * s + beta
    else:
        s = jnp.ones((Cout,), jnp.float32)
        shift = bias
    # (Cout,Cin,kh,kw) -> (kh,kw,Cin,Cout), BN scale folded in once on the host.
    w_mat = jnp.transpose(weight, (2, 3, 1, 0)).reshape(Kdim, Cout) * s[None, :]
    w_mat = jnp.pad(w_mat, ((0, 0), (0, Cout_pad - Cout))).astype(compute_dtype)

    if nl == 'relu':
        slope = jnp.zeros((Cout,), jnp.float32)
    elif nl == 'prelu':
        a = 0.25 if prelu_weight is None else prelu_weight
        slope = jnp.broadcast_to(jnp.asarray(a, jnp.float32), (Cout,))
    else:  # no activation
        slope = jnp.ones((Cout,), jnp.float32)

    shift_p = jnp.pad(shift.astype(jnp.float32),
                      (0, Cout_pad - Cout)).reshape(1, Cout_pad)
    slope_p = jnp.pad(slope.astype(jnp.float32),
                      (0, Cout_pad - Cout)).reshape(1, Cout_pad)

    kernel = functools.partial(_conv_bn_act_kernel, K=K, Wp=Wp, Cin=Cin)

    out = pl.pallas_call(
        kernel,
        out_shape=jax.ShapeDtypeStruct((N, M2p, Cout_pad), jnp.float32),
        grid_spec=pltpu.PrefetchScalarGridSpec(
            num_scalar_prefetch=0,
            grid=(N, n_t, n_j),          # j innermost: input band stays resident
            in_specs=[
                pl.BlockSpec((1, 1, B, Cin), lambda n, t, j: (n, t, 0, 0)),
                pl.BlockSpec((Kdim, tn), lambda n, t, j: (0, j)),
                pl.BlockSpec((1, tn), lambda n, t, j: (0, j)),
                pl.BlockSpec((1, tn), lambda n, t, j: (0, j)),
            ],
            out_specs=pl.BlockSpec((1, tm, tn), lambda n, t, j: (n, t, j)),
        ),
        compiler_params=pltpu.CompilerParams(
            dimension_semantics=("parallel", "parallel", "parallel"),
            vmem_limit_bytes=32 * 2**20,
        ),
    )(x_bands, w_mat, shift_p, slope_p)

    # ---- unflatten: drop padded rows/cols, stride-subsample, back to NCHW ----
    y = out[:, :M2, :Cout].reshape(N, Ho1, Wp, Cout)[:, :, :Wo1, :]
    if stride > 1:
        y = y[:, ::stride, ::stride, :]
    return jnp.transpose(y, (0, 3, 1, 2))


def _reference(x, weight, bias, gamma, beta, running_mean, running_var, *,
               stride=1, same_padding=True, eps=1e-5):
    K = weight.shape[-1]
    pad = (K - 1) // 2 if same_padding else 0
    y = lax.conv_general_dilated(
        x, weight, window_strides=(stride, stride),
        padding=[(pad, pad), (pad, pad)],
        dimension_numbers=("NCHW", "OIHW", "NCHW"))
    y = y + bias[None, :, None, None]
    s = gamma / jnp.sqrt(running_var + eps)
    y = (y - running_mean[None, :, None, None]) * s[None, :, None, None] \
        + beta[None, :, None, None]
    return jnp.maximum(y, 0.0)


if __name__ == "__main__":
    key = jax.random.PRNGKey(0)
    k1, k2, k3, k4, k5, k6 = jax.random.split(key, 6)

    N, Cin, H, W = 2, 4, 16, 16
    Cout, K = 8, 3

    x = jax.random.normal(k1, (N, Cin, H, W), dtype=jnp.float32)
    weight = jax.random.normal(k2, (Cout, Cin, K, K), dtype=jnp.float32) * 0.1
    bias = jax.random.normal(k3, (Cout,), dtype=jnp.float32) * 0.1
    gamma = 1.0 + 0.1 * jax.random.normal(k4, (Cout,), dtype=jnp.float32)
    beta = 0.1 * jax.random.normal(k5, (Cout,), dtype=jnp.float32)
    running_mean = 0.05 * jax.random.normal(k6, (Cout,), dtype=jnp.float32)
    running_var = jnp.ones((Cout,), dtype=jnp.float32)

    fn = jax.jit(functools.partial(conv2d_block, stride=1, same_padding=True))
    out = jax.block_until_ready(
        fn(x, weight, bias, gamma, beta, running_mean, running_var))

    ref = _reference(x, weight, bias, gamma, beta, running_mean, running_var)
    assert out.shape == (N, Cout, H, W), out.shape
    # Tolerance sized for bf16 matmul operands (accumulation is f32).
    err = float(jnp.max(jnp.abs(out - ref)))
    assert jnp.allclose(out, ref, atol=5e-2, rtol=5e-2), f"max abs err {err}"

    print("KERNEL_OK")
</pallas_src>

<mosaic_0001>
module attributes {stable_mosaic.version = 11 : i64} {
  func.func @_conv_bn_act_kernel(%arg0: i32, %arg1: i32, %arg2: i32, %arg3: memref<1x1x326x4xbf16, #tpu.memory_space<vmem>>, %arg4: memref<36x128xbf16, #tpu.memory_space<vmem>>, %arg5: memref<1x128xf32, #tpu.memory_space<vmem>>, %arg6: memref<1x128xf32, #tpu.memory_space<vmem>>, %arg7: memref<1x288x128xf32, #tpu.memory_space<vmem>>) attributes {dimension_semantics = [#tpu.dimension_semantics<parallel>, #tpu.dimension_semantics<parallel>, #tpu.dimension_semantics<parallel>], iteration_bounds = array<i64: 2, 1, 1>, scalar_prefetch = 0 : i64, scratch_operands = 0 : i64, tpu.core_type = #tpu.core_type<tc>, window_params = [{transform_indices = @transform_0, window_bounds = array<i64: 1, 1, 326, 4>}, {transform_indices = @transform_1, window_bounds = array<i64: 36, 128>}, {transform_indices = @transform_2, window_bounds = array<i64: 1, 128>}, {transform_indices = @transform_3, window_bounds = array<i64: 1, 128>}, {transform_indices = @transform_4, window_bounds = array<i64: 1, 288, 128>}]} {
    %c0 = arith.constant 0 : index
    %c0_0 = arith.constant 0 : index
    %0 = vector.load %arg4[%c0, %c0_0] : memref<36x128xbf16, #tpu.memory_space<vmem>>, vector<36x128xbf16>
    %c0_1 = arith.constant 0 : index
    %c0_2 = arith.constant 0 : index
    %c0_3 = arith.constant 0 : index
    %c0_4 = arith.constant 0 : index
    %1 = vector.load %arg3[%c0_1, %c0_2, %c0_3, %c0_4] : memref<1x1x326x4xbf16, #tpu.memory_space<vmem>>, vector<1x1x326x4xbf16>
    %2 = vector.shape_cast %1 : vector<1x1x326x4xbf16> to vector<326x4xbf16>
    %3 = arith.extf %2 : vector<326x4xbf16> to vector<326x4xf32>
    %4 = vector.extract_strided_slice %3 {offsets = [0, 0], sizes = [288, 4], strides = [1, 1]} : vector<326x4xf32> to vector<288x4xf32>
    %5 = arith.truncf %4 : vector<288x4xf32> to vector<288x4xbf16>
    %6 = vector.extract_strided_slice %0 {offsets = [0, 0], sizes = [4, 128], strides = [1, 1]} : vector<36x128xbf16> to vector<4x128xbf16>
    %cst = arith.constant dense<0.000000e+00> : vector<288x128xf32>
    %7 = tpu.matmul %5, %6, %cst {dimension_numbers = #tpu.dot_dimension_numbers<[1], [0], [0], [1], [0, 0, 1, 1], [], []>} : vector<288x4xbf16>, vector<4x128xbf16>, vector<288x128xf32> -> vector<288x128xf32>
    %8 = vector.extract_strided_slice %3 {offsets = [1, 0], sizes = [288, 4], strides = [1, 1]} : vector<326x4xf32> to vector<288x4xf32>
    %9 = arith.truncf %8 : vector<288x4xf32> to vector<288x4xbf16>
    %10 = vector.extract_strided_slice %0 {offsets = [4, 0], sizes = [4, 128], strides = [1, 1]} : vector<36x128xbf16> to vector<4x128xbf16>
    %cst_5 = arith.constant dense<0.000000e+00> : vector<288x128xf32>
    %11 = tpu.matmul %9, %10, %cst_5 {dimension_numbers = #tpu.dot_dimension_numbers<[1], [0], [0], [1], [0, 0, 1, 1], [], []>} : vector<288x4xbf16>, vector<4x128xbf16>, vector<288x128xf32> -> vector<288x128xf32>
    %12 = arith.addf %7, %11 : vector<288x128xf32>
    %13 = vector.extract_strided_slice %3 {offsets = [2, 0], sizes = [288, 4], strides = [1, 1]} : vector<326x4xf32> to vector<288x4xf32>
    %14 = arith.truncf %13 : vector<288x4xf32> to vector<288x4xbf16>
    %15 = vector.extract_strided_slice %0 {offsets = [8, 0], sizes = [4, 128], strides = [1, 1]} : vector<36x128xbf16> to vector<4x128xbf16>
    %cst_6 = arith.constant dense<0.000000e+00> : vector<288x128xf32>
    %16 = tpu.matmul %14, %15, %cst_6 {dimension_numbers = #tpu.dot_dimension_numbers<[1], [0], [0], [1], [0, 0, 1, 1], [], []>} : vector<288x4xbf16>, vector<4x128xbf16>, vector<288x128xf32> -> vector<288x128xf32>
    %17 = arith.addf %12, %16 : vector<288x128xf32>
    %18 = vector.extract_strided_slice %3 {offsets = [18, 0], sizes = [288, 4], strides = [1, 1]} : vector<326x4xf32> to vector<288x4xf32>
    %19 = arith.truncf %18 : vector<288x4xf32> to vector<288x4xbf16>
    %20 = vector.extract_strided_slice %0 {offsets = [12, 0], sizes = [4, 128], strides = [1, 1]} : vector<36x128xbf16> to vector<4x128xbf16>
    %cst_7 = arith.constant dense<0.000000e+00> : vector<288x128xf32>
    %21 = tpu.matmul %19, %20, %cst_7 {dimension_numbers = #tpu.dot_dimension_numbers<[1], [0], [0], [1], [0, 0, 1, 1], [], []>} : vector<288x4xbf16>, vector<4x128xbf16>, vector<288x128xf32> -> vector<288x128xf32>
    %22 = arith.addf %17, %21 : vector<288x128xf32>
    %23 = vector.extract_strided_slice %3 {offsets = [19, 0], sizes = [288, 4], strides = [1, 1]} : vector<326x4xf32> to vector<288x4xf32>
    %24 = arith.truncf %23 : vector<288x4xf32> to vector<288x4xbf16>
    %25 = vector.extract_strided_slice %0 {offsets = [16, 0], sizes = [4, 128], strides = [1, 1]} : vector<36x128xbf16> to vector<4x128xbf16>
    %cst_8 = arith.constant dense<0.000000e+00> : vector<288x128xf32>
    %26 = tpu.matmul %24, %25, %cst_8 {dimension_numbers = #tpu.dot_dimension_numbers<[1], [0], [0], [1], [0, 0, 1, 1], [], []>} : vector<288x4xbf16>, vector<4x128xbf16>, vector<288x128xf32> -> vector<288x128xf32>
    %27 = arith.addf %22, %26 : vector<288x128xf32>
    %28 = vector.extract_strided_slice %3 {offsets = [20, 0], sizes = [288, 4], strides = [1, 1]} : vector<326x4xf32> to vector<288x4xf32>
    %29 = arith.truncf %28 : vector<288x4xf32> to vector<288x4xbf16>
    %30 = vector.extract_strided_slice %0 {offsets = [20, 0], sizes = [4, 128], strides = [1, 1]} : vector<36x128xbf16> to vector<4x128xbf16>
    %cst_9 = arith.constant dense<0.000000e+00> : vector<288x128xf32>
    %31 = tpu.matmul %29, %30, %cst_9 {dimension_numbers = #tpu.dot_dimension_numbers<[1], [0], [0], [1], [0, 0, 1, 1], [], []>} : vector<288x4xbf16>, vector<4x128xbf16>, vector<288x128xf32> -> vector<288x128xf32>
    %32 = arith.addf %27, %31 : vector<288x128xf32>
    %33 = vector.extract_strided_slice %3 {offsets = [36, 0], sizes = [288, 4], strides = [1, 1]} : vector<326x4xf32> to vector<288x4xf32>
    %34 = arith.truncf %33 : vector<288x4xf32> to vector<288x4xbf16>
    %35 = vector.extract_strided_slice %0 {offsets = [24, 0], sizes = [4, 128], strides = [1, 1]} : vector<36x128xbf16> to vector<4x128xbf16>
    %cst_10 = arith.constant dense<0.000000e+00> : vector<288x128xf32>
    %36 = tpu.matmul %34, %35, %cst_10 {dimension_numbers = #tpu.dot_dimension_numbers<[1], [0], [0], [1], [0, 0, 1, 1], [], []>} : vector<288x4xbf16>, vector<4x128xbf16>, vector<288x128xf32> -> vector<288x128xf32>
    %37 = arith.addf %32, %36 : vector<288x128xf32>
    %38 = vector.extract_strided_slice %3 {offsets = [37, 0], sizes = [288, 4], strides = [1, 1]} : vector<326x4xf32> to vector<288x4xf32>
    %39 = arith.truncf %38 : vector<288x4xf32> to vector<288x4xbf16>
    %40 = vector.extract_strided_slice %0 {offsets = [28, 0], sizes = [4, 128], strides = [1, 1]} : vector<36x128xbf16> to vector<4x128xbf16>
    %cst_11 = arith.constant dense<0.000000e+00> : vector<288x128xf32>
    %41 = tpu.matmul %39, %40, %cst_11 {dimension_numbers = #tpu.dot_dimension_numbers<[1], [0], [0], [1], [0, 0, 1, 1], [], []>} : vector<288x4xbf16>, vector<4x128xbf16>, vector<288x128xf32> -> vector<288x128xf32>
    %42 = arith.addf %37, %41 : vector<288x128xf32>
    %43 = vector.extract_strided_slice %3 {offsets = [38, 0], sizes = [288, 4], strides = [1, 1]} : vector<326x4xf32> to vector<288x4xf32>
    %44 = arith.truncf %43 : vector<288x4xf32> to vector<288x4xbf16>
    %45 = vector.extract_strided_slice %0 {offsets = [32, 0], sizes = [4, 128], strides = [1, 1]} : vector<36x128xbf16> to vector<4x128xbf16>
    %cst_12 = arith.constant dense<0.000000e+00> : vector<288x128xf32>
    %46 = tpu.matmul %44, %45, %cst_12 {dimension_numbers = #tpu.dot_dimension_numbers<[1], [0], [0], [1], [0, 0, 1, 1], [], []>} : vector<288x4xbf16>, vector<4x128xbf16>, vector<288x128xf32> -> vector<288x128xf32>
    %47 = arith.addf %42, %46 : vector<288x128xf32>
    %c0_13 = arith.constant 0 : index
    %c0_14 = arith.constant 0 : index
    %48 = vector.load %arg5[%c0_13, %c0_14] : memref<1x128xf32, #tpu.memory_space<vmem>>, vector<1x128xf32>
    %49 = vector.broadcast %48 : vector<1x128xf32> to vector<288x128xf32>
    %50 = arith.addf %47, %49 : vector<288x128xf32>
    %cst_15 = arith.constant 0.000000e+00 : f32
    %51 = vector.broadcast %cst_15 : f32 to vector<288x128xf32>
    %52 = arith.maximumf %50, %51 : vector<288x128xf32>
    %c0_16 = arith.constant 0 : index
    %c0_17 = arith.constant 0 : index
    %53 = vector.load %arg6[%c0_16, %c0_17] : memref<1x128xf32, #tpu.memory_space<vmem>>, vector<1x128xf32>
    %cst_18 = arith.constant 0.000000e+00 : f32
    %54 = vector.broadcast %cst_18 : f32 to vector<288x128xf32>
    %55 = arith.minimumf %50, %54 : vector<288x128xf32>
    %56 = vector.broadcast %53 : vector<1x128xf32> to vector<288x128xf32>
    %57 = arith.mulf %56, %55 : vector<288x128xf32>
    %58 = arith.addf %52, %57 : vector<288x128xf32>
    %c0_19 = arith.constant 0 : index
    %c0_20 = arith.constant 0 : index
    %c0_21 = arith.constant 0 : index
    %59 = vector.load %arg7[%c0_19, %c0_20, %c0_21] : memref<1x288x128xf32, #tpu.memory_space<vmem>>, vector<1x288x128xf32>
    %60 = vector.shape_cast %59 : vector<1x288x128xf32> to vector<288x128xf32>
    %61 = vector.shape_cast %58 : vector<288x128xf32> to vector<1x288x128xf32>
    tpu.vector_store %arg7[%c0_19, %c0_20, %c0_21], %61 {strides = array<i32>} : memref<1x288x128xf32, #tpu.memory_space<vmem>>, vector<1x288x128xf32>,
    return
  }
  func.func @transform_0(%arg0: i32, %arg1: i32, %arg2: i32) -> (i32, i32, i32, i32) {
    %c0_i32 = arith.constant 0 : i32
    %c0_i32_0 = arith.constant 0 : i32
    %c0_i32_1 = arith.constant 0 : i32
    return %arg0, %arg1, %c0_i32, %c0_i32_0 : i32, i32, i32, i32
  }
  func.func @transform_1(%arg0: i32, %arg1: i32, %arg2: i32) -> (i32, i32) {
    %c0_i32 = arith.constant 0 : i32
    %c0_i32_0 = arith.constant 0 : i32
    return %c0_i32, %arg2 : i32, i32
  }
  func.func @transform_2(%arg0: i32, %arg1: i32, %arg2: i32) -> (i32, i32) {
    %c0_i32 = arith.constant 0 : i32
    %c0_i32_0 = arith.constant 0 : i32
    return %c0_i32, %arg2 : i32, i32
  }
  func.func @transform_3(%arg0: i32, %arg1: i32, %arg2: i32) -> (i32, i32) {
    %c0_i32 = arith.constant 0 : i32
    %c0_i32_0 = arith.constant 0 : i32
    return %c0_i32, %arg2 : i32, i32
  }
  func.func @transform_4(%arg0: i32, %arg1: i32, %arg2: i32) -> (i32, i32, i32) {
    %c0_i32 = arith.constant 0 : i32
    return %arg0, %arg1, %arg2 : i32, i32, i32
  }
}

</mosaic_0001>

<bundles_post_ra>
// kernel: conv2d_block.1
= control target key start
LH: loop header
LB: loop body
LE: loop exit
PB: predicated region body
PF: predicated region fallthrough
CT: control target
= control target key end

     0   :  { %s4624_s15 = smov 0   ;;  %s4626_s16 = smov 0   ;;  %s5712_s0 = inlined_call_operand.vmem [shape: bf16[2,1,326,4], index: 0, kind: input, shape index: {}]   ;;  %s5713_s1 = inlined_call_operand.vmem [shape: bf16[36,128], index: 1, kind: input, shape index: {}]   ;;  %s5714_s2 = inlined_call_operand.vmem [shape: f32[1,128], index: 2, kind: input, shape index: {}]   ;;  %s5715_s3 = inlined_call_operand.vmem [shape: f32[1,128], index: 3, kind: input, shape index: {}]   ;;  %s5716_s4 = inlined_call_operand.vmem [shape: f32[2,288,128], index: 4, kind: output, shape index: {}]  }
   0x1   :  { %s4628_s17 = smov 0  }
   0x2 LB: > { %s33_s18 = sadd.s32 1, %s4593_s16  ;;  %p3513_p0 = scmp.ge.s32.totalorder %s4597_s17, 1  ;;  %s4597_s17 = sphi %s4628_s17, %s14_s17   ;;  %s4593_s16 = sphi %s4626_s16, %s5785_s16   ;;  %s4589_s15 = sphi %s4624_s15, %s5784_s15  }
   0x3   : > { %p35_p1 = scmp.ge.s32.totalorder %s33_s18, 2  ;;  %p216_p2 = scmp.lt.s32.totalorder %s4597_s17, 3 }
   0x5   : > { %s5787_s18 = smov (%p35_p1, %s33_s18), 0  ;;  %p217_p3 = pnand %p3513_p0, %p216_p2 }
   0x7   : > { %220 = sbr.rel (%p217_p3) target bundleno = 577 (0x241), region = 36 }
   0xe   : > { %v4645_v0 = vld [vmem:[%s5713_s1 + $0x8] sm:$0xf]  ;;  %vm610_vm0 = vcmask 1041408   ;;  %v296_v1 = vld [vmem:[%s5713_s1] sm:$0xf]  ;;  %p263_p4 = scmp.lt.s32.totalorder %s4589_s15, 1 }
   0xf   : > { %4516 = vmatprep.subr.msk.bf16.mxu0 %vm610_vm0, %v4645_v0  ;;  %v3629_v2 = vcombine.low %v4645_v0, %v4645_v0  ;;  %v3535_v3 = vcombine.low %v296_v1, %v296_v1  ;;  %v4656_v4 = vsel %vm610_vm0, %v4645_v0, 0  ;;  %vm402_vm1 = vsmask.f32 7424  ;;  %v4716_v38 = vld [vmem:[%s5713_s1 + $0x4] sm:$0xf] }
  0x10   : > { %5748 = vst [vmem:[#allocation2_spill] sm:$0xff] %v4656_v4  ;;  %4033 = vmatpush3.bf16.msra.mxu0 %v4656_v4  ;;  %s5789_s15 = smov (!%p263_p4, %s4589_s15), 1  ;;  %vm1568_vm2 = vsmask.f32 6400  ;;  %vm555_vm3 = vcmask 31744   ;;  %v828_v10 = vsel %vm610_vm0, %v296_v1, 0 }
  0x11   : > { %v554_v5 = vrot.slane %v3535_v3, 2  ;;  %v1965_v6 = vrot.slane %v3629_v2, 2  ;;  %s4522_s23 = smul.u32 164, %s5789_s15  ;;  %v4747_v53 = vld [vmem:[%s5713_s1 + $0xc] sm:$0xf]  ;;  %vm1924_vm4 = vcmask 1045504  }
  0x12   : > { %vm2466_vm5 = vsmask.f32 5376  ;;  %vm1026_vm6 = vcmask 1046528   ;;  %vm2826_vm7 = vcmask 1044480   ;;  %s4523_s9 = smul.u32 288, %s5789_s15 }
  0x13   : > { %4512 = vmatprep.subr.msk.bf16.mxu1 %vm610_vm0, %v554_v5  ;;  %v612_v7 = vsel %vm610_vm0, %v554_v5, 0  ;;  %4518 = vmatprep.subr.msk.bf16.mxu0 %vm610_vm0, %v1965_v6  ;;  %s4668_s26 = scalar_lea.vmem %s5712_s0, %s4522_s23  ;;  %v2021_v12 = vsel %vm610_vm0, %v1965_v6, 0 }
  0x14   : > { %3881 = vmatpush3.bf16.msra.mxu1 %v612_v7  ;;  %v4672_v8 = vld [vmem:[%s4668_s26] sm:$0xff]   ;;  %v4675_v9 = vld [vmem:[%s4668_s26 + $0x8] sm:$0xff]   ;;  %v4679_v11 = vld [vmem:[%s4668_s26 + $0x10] sm:$0xff]   ;;  %s5586_s14 = scalar_lea.vmem %s5716_s4, %s4523_s9 }
  0x15   : > { %4513 = vmatprep.subr.msk.bf16.mxu1 %vm610_vm0, %v296_v1  ;;  %v404_v13 = vshrl.u32 %v4672_v8, 16  ;;  %v406_v14 = vshll.u32 %v4672_v8, 16  ;;  %v411_v15 = vshll.u32 %v4675_v9, 16  ;;  %v415_v16 = vshrl.u32 %v4675_v9, 16  ;;  %v4693_v19 = vld [vmem:[%s4668_s26 + $0x18] sm:$0xff]   ;;  %v4696_v20 = vld [vmem:[%s4668_s26 + $0x20] sm:$0xff]  }
  0x16   : > { %v4687_v17 = vshll.u32 %v4679_v11, 16  ;;  %v4690_v18 = vshrl.u32 %v4679_v11, 16  ;;  %v4702_v28 = vshll.u32 %v4693_v19, 16  ;;  %v4705_v32 = vshrl.u32 %v4693_v19, 16  ;;  %v4708_v33 = vld [vmem:[%s4668_s26 + $0x28] sm:$0xff]   ;;  %v4725_v43 = vld [vmem:[%s4668_s26 + $0x30] sm:$0xff]  }
  0x17   : > { %v408_v21 = vrot.slane %v406_v14, 1  ;;  %v413_v22 = vrot.slane %v411_v15, 1  ;;  %v1569_v23 = vrot.slane %v415_v16, 1  ;;  %v1570_v24 = vrot.slane %v411_v15, 2  ;;  %v4742_v52 = vld [vmem:[%s4668_s26 + $0x38] sm:$0xff]   ;;  %v4770_v2 = vld [vmem:[%s4668_s26 + $0x40] sm:$0xff]  }
  0x18   : > { %v1572_v25 = vrot.slane %v4690_v18, 1  ;;  %v1573_v26 = vrot.slane %v4687_v17, 2  ;;  %v421_v27 = vrot.slane %v4687_v17, 1  ;;  %v1577_v35 = vrot.slane %v4702_v28, 2 }
  0x19   : > { %v409_v29 = vor.u32 %v408_v21, %v404_v13  ;;  %v417_v30 = vor.u32 %v415_v16, %v413_v22  ;;  %v1571_v31 = vor.u32 %v1570_v24, %v1569_v23  ;;  %v429_v37 = vrot.slane %v4702_v28, 1 }
  0x1a   : > { %v1574_v34 = vor.u32 %v1573_v26, %v1572_v25  ;;  %v425_v36 = vor.u32 %v4690_v18, %v421_v27  ;;  %v1576_v41 = vrot.slane %v4705_v32, 1  ;;  %v4722_v42 = vshll.u32 %v4696_v20, 16  ;;  %v4797_v25 = vld [vmem:[%s4668_s26 + $0x48] sm:$0xff]  }
  0x1b   : > { %v414_v39 = vsel %vm402_vm1, %v409_v29, %v413_v22  ;;  %v422_v40 = vsel %vm402_vm1, %v417_v30, %v421_v27  ;;  %v4731_v46 = vshrl.u32 %v4696_v20, 16  ;;  %v433_v47 = vor.u32 %v4705_v32, %v429_v37  ;;  %v4804_v30 = vld [vmem:[%s4668_s26 + $0x50] sm:$0xff]  }
  0x1c   : > { %3882 = vmatprep.mubr.msk.bf16.mxu1 %vm555_vm3, %v414_v39  ;;  %v1575_v44 = vsel %vm1568_vm2, %v1571_v31, %v1574_v34  ;;  %v430_v45 = vsel %vm402_vm1, %v425_v36, %v429_v37  ;;  %v1578_v48 = vor.u32 %v1577_v35, %v1576_v41  ;;  %v1581_v49 = vrot.slane %v4722_v42, 2 }
  0x1d   : > { %4034 = vmatprep.mubr.msk.bf16.mxu0 %vm555_vm3, %v1575_v44  ;;  %3883 = vmatmul.mubr.msk.bf16.vlgmr.msra.gmra.mrb[0].mxu1 %vm555_vm3, %v422_v40  ;;  %v437_v50 = vrot.slane %v4722_v42, 1  ;;  %v4739_v51 = vshll.u32 %v4708_v33, 16  ;;  %v1580_v54 = vrot.slane %v4731_v46, 1  ;;  %v4752_v55 = vshrl.u32 %v4708_v33, 16 }
  0x1e   : > { %3886 = vmatprep.mubr.msk.bf16.mxu1 %vm555_vm3, %v430_v45  ;;  %3919 = vmatpush3.bf16.msra.mxu1 %v828_v10  ;;  %v4755_v56 = vshll.u32 %v4725_v43, 16  ;;  %v4758_v57 = vshrl.u32 %v4725_v43, 16  ;;  %v1579_v58 = vsel %vm1568_vm2, %v1574_v34, %v1578_v48  ;;  %v4774_v5 = vshll.u32 %v4742_v52, 16 }
  0x1f   : > { %v1585_v59 = vrot.slane %v4739_v51, 2  ;;  %v441_v60 = vor.u32 %v4731_v46, %v437_v50  ;;  %4514 = vmatprep.subr.msk.bf16.mxu1 %vm610_vm0, %v4716_v38  ;;  %4035 = vmatmul.mubr.msk.bf16.vlgmr.msra.gmra.mrb[0].mxu0 %vm555_vm3, %v1579_v58  ;;  %v1582_v61 = vor.u32 %v1581_v49, %v1580_v54  ;;  %v1584_v62 = vrot.slane %v4752_v55, 1  ;;  %v4831_v58 = vld [vmem:[%s4668_s26 + $0x58] sm:$0xff]  }
  0x20   : > { %v445_v63 = vrot.slane %v4739_v51, 1  ;;  %v1588_v1 = vrot.slane %v4758_v57, 1  ;;  %4071 = vmatpush3.bf16.msra.mxu0 %v2021_v12  ;;  %v1589_v3 = vrot.slane %v4755_v56, 2  ;;  %v4777_v6 = vshrl.u32 %v4742_v52, 16 }
  0x21   : > { %v1583_v7 = vsel %vm1568_vm2, %v1578_v48, %v1582_v61  ;;  %v438_v10 = vsel %vm402_vm1, %v433_v47, %v437_v50  ;;  %v1586_v13 = vor.u32 %v1585_v59, %v1584_v62  ;;  %4519 = vmatprep.subr.msk.bf16.mxu0 %vm610_vm0, %v4747_v53  ;;  %v453_v15 = vrot.slane %v4755_v56, 1 }
  0x22   : > { %4038 = vmatprep.mubr.msk.bf16.mxu0 %vm555_vm3, %v1583_v7  ;;  %v446_v12 = vsel %vm402_vm1, %v441_v60, %v445_v63  ;;  %v1590_v14 = vor.u32 %v1589_v3, %v1588_v1  ;;  %v4787_v16 = vshll.u32 %v4770_v2, 16  ;;  %v1592_v22 = vrot.slane %v4777_v6, 1 }
  0x23   : > { %v1587_v21 = vsel %vm1568_vm2, %v1582_v61, %v1586_v13  ;;  %v1593_v23 = vrot.slane %v4774_v5, 2  ;;  %v4794_v24 = vshrl.u32 %v4770_v2, 16  ;;  %v449_v27 = vor.u32 %v4752_v55, %v445_v63 }
  0x24   : > { %v1591_v26 = vsel %vm1568_vm2, %v1586_v13, %v1590_v14  ;;  %v1597_v29 = vrot.slane %v4787_v16, 2  ;;  %v457_v31 = vor.u32 %v4758_v57, %v453_v15  ;;  %v461_v34 = vrot.slane %v4774_v5, 1 }
  0x25   : > { %3887 = vmatmul.mubr.msk.bf16.gmra.mrb[4].mxu1 %vm555_vm3, %v438_v10  ;;  %v1596_v35 = vrot.slane %v4794_v24, 1  ;;  %v1594_v36 = vor.u32 %v1593_v23, %v1592_v22  ;;  %v4812_v37 = vshll.u32 %v4797_v25, 16  ;;  %v4815_v39 = vshrl.u32 %v4797_v25, 16 }
  0x26   : > { %3890 = vmatprep.mubr.msk.bf16.mxu1 %vm555_vm3, %v446_v12  ;;  %v454_v40 = vsel %vm402_vm1, %v449_v27, %v453_v15  ;;  %v4819_v44 = vshll.u32 %v4804_v30, 16  ;;  %v4822_v45 = vshrl.u32 %v4804_v30, 16  ;;  %v462_v47 = vsel %vm402_vm1, %v457_v31, %v461_v34  ;;  %v4851_v15 = vld [vmem:[%s4668_s26 + $0x88] sm:$0xff]   ;;  %v4859_v27 = vld [vmem:[%s4668_s26 + $0x60] sm:$0xff]  }
  0x27   : > { %4039 = vmatmul.mubr.msk.bf16.gmra.mrb[4].mxu0 %vm555_vm3, %v1587_v21  ;;  %v1598_v41 = vor.u32 %v1597_v29, %v1596_v35  ;;  %v1595_v48 = vsel %vm1568_vm2, %v1590_v14, %v1594_v36  ;;  %v469_v49 = vrot.slane %v4787_v16, 1  ;;  %v1600_v50 = vrot.slane %v4815_v39, 1  ;;  %v337_v29 = vld [vmem:[%s4668_s26 + $0x90] sm:$0xf] }
  0x28   : > { %4042 = vmatprep.mubr.msk.bf16.mxu0 %vm555_vm3, %v1591_v26  ;;  %v1601_v54 = vrot.slane %v4812_v37, 2  ;;  %v465_v60 = vor.u32 %v4777_v6, %v461_v34  ;;  %v1604_v61 = vrot.slane %v4822_v45, 1  ;;  %v1605_v62 = vrot.slane %v4819_v44, 2 }
  0x29   : > { %v1599_v59 = vsel %vm1568_vm2, %v1594_v36, %v1598_v41  ;;  %v473_v63 = vor.u32 %v4794_v24, %v469_v49  ;;  %v477_v1 = vrot.slane %v4812_v37, 1  ;;  %v4843_v7 = vshll.u32 %v4831_v58, 16 }
  0x2a   : > { %v1602_v3 = vor.u32 %v1601_v54, %v1600_v50  ;;  %v4846_v10 = vshrl.u32 %v4831_v58, 16  ;;  %v470_v13 = vsel %vm402_vm1, %v465_v60, %v469_v49  ;;  %v1606_v12 = vor.u32 %v1605_v62, %v1604_v61 }
  0x2b   : > { %5749 = vst [vmem:[#allocation3_spill] sm:$0xff] %v4843_v7  ;;  %v478_v14 = vsel %vm402_vm1, %v473_v63, %v477_v1  ;;  %v485_v22 = vrot.slane %v4819_v44, 1  ;;  %v1609_v26 = vrot.slane %v4843_v7, 2  ;;  %v481_v34 = vor.u32 %v4815_v39, %v477_v1 }
  0x2c   : > { %5750 = vst [vmem:[#allocation4_spill] sm:$0xff] %v4846_v10  ;;  %v1603_v21 = vsel %vm1568_vm2, %v1598_v41, %v1602_v3  ;;  %v1608_v23 = vrot.slane %v4846_v10, 1  ;;  %v1607_v31 = vsel %vm1568_vm2, %v1602_v3, %v1606_v12  ;;  %v493_v36 = vrot.slane %v4843_v7, 1 }
  0x2d   : > { %3891 = vmatmul.mubr.msk.bf16.gmra.mrb[8].mxu1 %vm555_vm3, %v454_v40  ;;  %v489_v35 = vor.u32 %v4822_v45, %v485_v22  ;;  %v4868_v40 = vld [vmem:[%s4668_s26 + $0x68] sm:$0xff]   ;;  %v4871_v41 = vshll.u32 %v4851_v15, 16  ;;  %v4883_v50 = vshll.u32 %v4859_v27, 16  ;;  %v1925_v60 = vrot.slane %v4675_v9, 2 }
  0x2e   : > { %3894 = vmatprep.mubr.msk.bf16.mxu1 %vm555_vm3, %v462_v47  ;;  %v4874_v47 = vcombine.low %v337_v29, %v337_v29  ;;  %v4880_v49 = vor.u32 %v1609_v26, %v1608_v23  ;;  %v1926_v61 = vrot.slane %v4679_v11, 2  ;;  %v4892_v1 = vshrl.u32 %v4859_v27, 16  ;;  %v4905_v23 = vld [vmem:[%s4668_s26 + $0x70] sm:$0xff]  }
  0x2f   : > { %4043 = vmatmul.mubr.msk.bf16.gmra.mrb[8].mxu0 %vm555_vm3, %v1595_v48  ;;  %v4877_v48 = vshrl.u32 %v4851_v15, 16  ;;  %5754 = vst [vmem:[#allocation8_spill] sm:$0xff] %v4883_v50  ;;  %v5717_v54 = vrot.slane %v4871_v41, 1  ;;  %v494_v63 = vsel %vm402_vm1, %v489_v35, %v493_v36  ;;  %v4895_v3 = vshll.u32 %v4868_v40, 16 }
  0x30   : > { %4046 = vmatprep.mubr.msk.bf16.mxu0 %vm555_vm3, %v1599_v59  ;;  %5751 = vst [vmem:[#allocation5_spill] sm:$0xff] %v4874_v47  ;;  %5753 = vst [vmem:[#allocation7_spill] sm:$0xff] %v4880_v49  ;;  %v486_v59 = vsel %vm402_vm1, %v481_v34, %v485_v22  ;;  %v547_v62 = vshll.u32 %v4874_v47, 16  ;;  %v501_v22 = vrot.slane %v4883_v50, 1  ;;  %v1927_v26 = vsel %vm1924_vm4, %v1925_v60, %v1926_v61 }
  0x31   : > { %5752 = vst [vmem:[#allocation6_spill] sm:$0xff] %v4877_v48  ;;  %5755 = vst [vmem:[#allocation9_spill] sm:$0xff] %v4892_v1  ;;  %v4922_v60 = vshll.u32 %v4905_v23, 16  ;;  %v5765_v7 = vrot.slane %v4871_v41, 1  ;;  %v2475_v47 = vrot.slane %v4722_v42, 3  ;;  %v1940_v42 = vrot.slane %v4797_v25, 2 }
  0x32   : > { %5756 = vst [vmem:[#allocation10_spill] sm:$0xff] %v4895_v3  ;;  %v505_v35 = vor.u32 %v4892_v1, %v501_v22 }
  0x33   : > { %5757 = vst [vmem:[#allocation11_spill] sm:$0xff] %v4922_v60 }
  0x35   : > { %3895 = vmatmul.mubr.msk.bf16.gmra.mrb[12].mxu1 %vm555_vm3, %v470_v13  ;;  %v545_v13 = vor.u32 %v4877_v48, %v5717_v54  ;;  %v4945_v48 = vld [vmem:[%s4668_s26 + $0x80] sm:$0xff]  }
  0x36   : > { %3898 = vmatprep.mubr.msk.bf16.mxu1 %vm555_vm3, %v478_v14  ;;  %v549_v14 = vrot.slane %v547_v62, 1  ;;  %v4916_v62 = vld [vmem:[%s4668_s26 + $0x78] sm:$0xff]  }
  0x37   : > { %4047 = vmatmul.mubr.msk.bf16.gmra.mrb[12].mxu0 %vm555_vm3, %v1603_v21  ;;  %v1611_v21 = vsel %vm1568_vm2, %v1606_v12, %v4880_v49  ;;  %v1928_v12 = vrot.slane %v4693_v19, 2  ;;  %v338_v49 = vld [vmem:[%s4668_s26 + $0x94] sm:$0xf] }
  0x38   : > { %4050 = vmatprep.mubr.msk.bf16.mxu0 %vm555_vm3, %v1607_v31  ;;  %v497_v31 = vor.u32 %v4846_v10, %v493_v36  ;;  %v4911_v34 = vsel %vm402_vm1, %v545_v13, %v549_v14  ;;  %v3668_v36 = vcombine.low %v4747_v53, %v4747_v53  ;;  %v1930_v13 = vrot.slane %v4696_v20, 2 }
  0x39   : > { %v4929_v14 = vshrl.u32 %v4868_v40, 16  ;;  %v4958_v1 = vcombine.low %v337_v29, %v338_v49  ;;  %v1934_v49 = vrot.slane %v4725_v43, 2  ;;  %v2474_v10 = vrot.slane %v4731_v46, 2 }
  0x3a   : > { %v4947_v4 = vrot.slane %v3668_v36, 2  ;;  %v4963_v36 = vld [vmem:[%s4668_s26 + $0x98] sm:$0xf]  ;;  %v2478_v46 = vrot.slane %v4752_v55, 2 }
  0x3b   : > { %5758 = vst [vmem:[#allocation12_spill] sm:$0xff] %v4929_v14  ;;  %5761 = vst [vmem:[#allocation15_spill] sm:$0xff] %v4958_v1 }
  0x3d   : > { %3899 = vmatmul.mubr.msk.bf16.gmra.mrb[16].mxu1 %vm555_vm3, %v486_v59  ;;  %v509_v59 = vrot.slane %v4895_v3, 1  ;;  %v4953_v3 = vsel %vm1924_vm4, %v1928_v12, %v1930_v13 }
  0x3e   : > { %3902 = vmatprep.mubr.msk.bf16.mxu1 %vm555_vm3, %v494_v63  ;;  %v502_v63 = vsel %vm402_vm1, %v497_v31, %v501_v22  ;;  %v4941_v22 = vsel %vm1924_vm4, %v1926_v61, %v1928_v12  ;;  %v517_v31 = vrot.slane %v4922_v60, 1  ;;  %v340_v60 = vld [vmem:[%s4668_s26 + $0x9c] sm:$0xf]  ;;  %v4978_v12 = vshrl.u32 %v4916_v62, 16 }
  0x3f   : > { %4051 = vmatmul.mubr.msk.bf16.gmra.mrb[16].mxu0 %vm555_vm3, %v1611_v21  ;;  %v510_v54 = vsel %vm402_vm1, %v505_v35, %v509_v59  ;;  %v4933_v21 = vshrl.u32 %v4905_v23, 16  ;;  %v2251_v35 = vsel %vm610_vm0, %v4747_v53, 0  ;;  %v513_v50 = vor.u32 %v4929_v14, %v509_v59 }
  0x40   : > { %4072 = vmatprep.mubr.msk.bf16.mxu0 %vm555_vm3, %v1927_v26  ;;  %v4936_v26 = vshll.u32 %v4916_v62, 16  ;;  %v1932_v53 = vrot.slane %v4708_v33, 2  ;;  %v4973_v59 = vcombine.low %v4963_v36, %v340_v60  ;;  %5763 = vst [vmem:[#allocation17_spill] sm:$0xff] %v4978_v12 }
  0x41   : > { %5759 = vst [vmem:[#allocation13_spill] sm:$0xff] %v4933_v21  ;;  %v518_v29 = vsel %vm402_vm1, %v513_v50, %v517_v31 }
  0x42   : > { %5760 = vst [vmem:[#allocation14_spill] sm:$0xff] %v4936_v26  ;;  %v525_v61 = vrot.slane %v4936_v26, 1  ;;  %v4984_v26 = vshrl.u32 %v4945_v48, 16  ;;  %v5740_v60 = vrot.slane %v4973_v59, 2  ;;  %v4992_v50 = vsel %vm1924_vm4, %v1930_v13, %v1932_v53 }
  0x43   : > { %v2467_v13 = vrot.slane %v4690_v18, 2 }
  0x44   : > { %5764 = vst [vmem:[#allocation18_spill] sm:$0xff] %v4984_v26  ;;  %v529_v14 = vor.u32 %v4978_v12, %v525_v61 }
  0x45   : > { %3903 = vmatmul.mubr.msk.bf16.gmra.mrb[20].mxu1 %vm555_vm3, %v502_v63  ;;  %v521_v63 = vor.u32 %v4933_v21, %v517_v31  ;;  %v4987_v21 = vrot.slane %v4958_v1, 2  ;;  %v5003_v1 = vsel %vm1924_vm4, %v1932_v53, %v1934_v49  ;;  %v2471_v53 = vrot.slane %v4702_v28, 3 }
  0x46   : > { %3906 = vmatprep.mubr.msk.bf16.mxu1 %vm555_vm3, %v510_v54  ;;  %v4970_v54 = vshll.u32 %v4945_v48, 16 }
  0x47   : > { %4073 = vmatmul.mubr.msk.bf16.vlgmr.msra.gmra.mrb[0].mxu0 %vm555_vm3, %v4941_v22 }
  0x48   : > { %4109 = vmatpush3.bf16.msra.mxu0 %v2251_v35  ;;  %4076 = vmatprep.mubr.msk.bf16.mxu0 %vm555_vm3, %v4953_v3  ;;  %5762 = vst [vmem:[#allocation16_spill] sm:$0xff] %v4970_v54  ;;  %v526_v35 = vsel %vm402_vm1, %v521_v63, %v525_v61  ;;  %v533_v31 = vrot.slane %v4970_v54, 1  ;;  %v4999_v63 = vsel %vm1924_vm4, %v4987_v21, %v5740_v60  ;;  %v2468_v54 = vrot.slane %v4687_v17, 3 }
  0x49   : > { %4520 = vmatprep.subr.msk.bf16.mxu0 %vm610_vm0, %v4947_v4  ;;  %v1936_v60 = vrot.slane %v4742_v52, 2 }
  0x4a   : > { %v534_v61 = vsel %vm402_vm1, %v529_v14, %v533_v31  ;;  %v2469_v12 = vor.u32 %v2468_v54, %v2467_v13  ;;  %v2476_v14 = vor.u32 %v2475_v47, %v2474_v10  ;;  %v2479_v10 = vrot.slane %v4739_v51, 3 }
  0x4b   : > { %v1942_v47 = vrot.slane %v4804_v30, 2  ;;  %v1944_v13 = vrot.slane %v4831_v58, 2 }
  0x4d   : > { %3907 = vmatmul.mubr.msk.bf16.gmra.mrb[24].mxu1 %vm555_vm3, %v518_v29  ;;  %v537_v29 = vor.u32 %v4984_v26, %v533_v31  ;;  %v1938_v26 = vrot.slane %v4770_v2, 2  ;;  %v5058_v51 = vsel %vm1924_vm4, %v1940_v42, %v1942_v47 }
  0x4e   : > { %3910 = vmatprep.mubr.msk.bf16.mxu1 %vm555_vm3, %v526_v35  ;;  %v2470_v35 = vrot.slane %v4705_v32, 2  ;;  %v5025_v32 = vsel %vm1924_vm4, %v1934_v49, %v1936_v60  ;;  %v2480_v49 = vor.u32 %v2479_v10, %v2478_v46  ;;  %v1948_v10 = vrot.slane %v4868_v40, 2 }
  0x4f   : > { %4077 = vmatmul.mubr.msk.bf16.gmra.mrb[4].mxu0 %vm555_vm3, %v4992_v50  ;;  %v542_v18 = vsel %vm402_vm1, %v537_v29, %v5765_v7  ;;  %v5032_v54 = vsel %vm1924_vm4, %v1936_v60, %v1938_v26  ;;  %v2483_v60 = vrot.slane %v4755_v56, 3  ;;  %v5050_v31 = vsel %vm1924_vm4, %v1938_v26, %v1940_v42 }
  0x50   : > { %4080 = vmatprep.mubr.msk.bf16.mxu0 %vm555_vm3, %v5003_v1  ;;  %v2472_v17 = vor.u32 %v2471_v53, %v2470_v35  ;;  %v5053_v29 = vsel %vm2466_vm5, %v2476_v14, %v2480_v49  ;;  %v2487_v26 = vrot.slane %v4774_v5, 3  ;;  %v1946_v35 = vrot.slane %v4859_v27, 2 }
  0x51   : > { %v5085_v5 = vsel %vm1924_vm4, %v1942_v47, %v1944_v13  ;;  %v1950_v47 = vrot.slane %v4905_v23, 2 }
  0x52   : > { %v5028_v28 = vsel %vm2466_vm5, %v2469_v12, %v2472_v17  ;;  %v5035_v7 = vsel %vm2466_vm5, %v2472_v17, %v2476_v14  ;;  %v2482_v12 = vrot.slane %v4758_v57, 2  ;;  %v3592_v57 = vcombine.low %v4716_v38, %v4716_v38 }
  0x53   : > { %v2490_v17 = vrot.slane %v4794_v24, 2  ;;  %v2491_v14 = vrot.slane %v4787_v16, 3  ;;  %v5090_v46 = vsel %vm1924_vm4, %v1944_v13, %v1946_v35  ;;  %v2494_v16 = vrot.slane %v4815_v39, 2 }
  0x54   : > { %v2484_v55 = vor.u32 %v2483_v60, %v2482_v12  ;;  %v2495_v24 = vrot.slane %v4812_v37, 3  ;;  %v2498_v12 = vrot.slane %v4822_v45, 2  ;;  %v2499_v60 = vrot.slane %v4819_v44, 3 }
  0x55   : > { %3911 = vmatmul.mubr.msk.bf16.gmra.mrb[28].mxu1 %vm555_vm3, %v534_v61  ;;  %v5073_v61 = vrot.slane %v3592_v57, 2  ;;  %v2492_v42 = vor.u32 %v2491_v14, %v2490_v17  ;;  %v5113_v37 = vsel %vm1924_vm4, %v1946_v35, %v1948_v10  ;;  %v5120_v57 = vsel %vm1924_vm4, %v1948_v10, %v1950_v47 }
  0x56   : > { %3914 = vmatprep.mubr.msk.bf16.mxu1 %vm555_vm3, %v542_v18  ;;  %v5065_v56 = vsel %vm2466_vm5, %v2480_v49, %v2484_v55  ;;  %v1119_v18 = vsel %vm610_vm0, %v4716_v38, 0  ;;  %v2496_v49 = vor.u32 %v2495_v24, %v2494_v16  ;;  %v5115_v39 = vor.u32 %v2499_v60, %v2498_v12  ;;  %v5282_v12 = vld [vmem:[%s4668_s26 + $0xa0] ss:$0 sps:$4 sm:$0x77]  }
  0x57   : > { %4081 = vmatmul.mubr.msk.bf16.gmra.mrb[8].mxu0 %vm555_vm3, %v5025_v32  ;;  %v1952_v45 = vrot.slane %v4916_v62, 2  ;;  %v1956_v35 = vrot.slane %v4851_v15, 2  ;;  %v1042_v24 = vrot.slane %v4770_v2, 1  ;;  %v1044_v10 = vrot.slane %v4797_v25, 1 }
  0x58   : > { %4084 = vmatprep.mubr.msk.bf16.mxu0 %vm555_vm3, %v5032_v54  ;;  %v5124_v44 = vsel %vm2466_vm5, %v2496_v49, %v5115_v39  ;;  %v1046_v60 = vrot.slane %v4804_v30, 1 }
  0x59   : > { %v5160_v17 = vsel %vm1924_vm4, %v1956_v35, %v4987_v21 }
  0x5d   : > { %3915 = vmatmul.mubr.msk.bf16.gmra.mrb[32].mxu1 %vm555_vm3, %v4911_v34  ;;  %v2486_v34 = vrot.slane %v4777_v6, 2 }
  0x5e   : > { %3920 = vmatprep.mubr.msk.bf16.mxu1 %vm555_vm3, %v4672_v8 }
  0x5f   : > { %4085 = vmatmul.mubr.msk.bf16.gmra.mrb[12].mxu0 %vm555_vm3, %v5050_v31  ;;  %v2488_v53 = vor.u32 %v2487_v26, %v2486_v34  ;;  %v1954_v34 = vrot.slane %v4945_v48, 2  ;;  %v5135_v26 = vsel %vm1924_vm4, %v1950_v47, %v1952_v45 }
  0x60   : > { %4088 = vmatprep.mubr.msk.bf16.mxu0 %vm555_vm3, %v5058_v51 }
  0x61   : > { %v5080_v6 = vsel %vm2466_vm5, %v2484_v55, %v2488_v53  ;;  %v5095_v38 = vsel %vm2466_vm5, %v2488_v53, %v2492_v42  ;;  %v5108_v55 = vsel %vm2466_vm5, %v2492_v42, %v2496_v49  ;;  %v5140_v13 = vsel %vm1924_vm4, %v1952_v45, %v1954_v34 }
  0x62   : > { %v5150_v53 = vsel %vm1924_vm4, %v1954_v34, %v1956_v35  ;;  %v2611_v42 = vsel %vm610_vm0, %v4947_v4, 0  ;;  %v1027_v4 = vrot.slane %v4672_v8, 1  ;;  %v1032_v8 = vrot.slane %v4693_v19, 1 }
  0x63   : > { %v5277_v49 = vsel %vm1026_vm6, %v1042_v24, %v1044_v10  ;;  %v5294_v45 = vsel %vm1026_vm6, %v1044_v10, %v1046_v60  ;;  %v1052_v35 = vrot.slane %v4868_v40, 1 }
  0x65   : > { %3921 = vmatmul.mubr.msk.bf16.vlgmr.msra.gmra.mrb[0].mxu1 %vm555_vm3, %v4675_v9 }
  0x66   : > { %3924 = vmatprep.mubr.msk.bf16.mxu1 %vm555_vm3, %v4679_v11  ;;  %3957 = vmatpush3.bf16.msra.mxu1 %v1119_v18  ;;  %v5154_v18 = vcombine.low %v4963_v36, %v4963_v36 }
  0x67   : > { %4515 = vmatprep.subr.msk.bf16.mxu1 %vm610_vm0, %v5073_v61  ;;  %4089 = vmatmul.mubr.msk.bf16.gmra.mrb[16].mxu0 %vm555_vm3, %v5085_v5 }
  0x68   : > { %4092 = vmatprep.mubr.msk.bf16.mxu0 %vm555_vm3, %v5090_v46  ;;  %v1960_v14 = vrot.slane %v5154_v18, 2 }
  0x6a   : > { %v1961_v36 = vsel %vm1924_vm4, %v4987_v21, %v1960_v14  ;;  %v5185_v21 = vld [vmem:[%s5713_s1 + $0x10] sm:$0x3] }
  0x6b   : > { %v2919_v14 = vsel %vm610_vm0, %v5185_v21, 0 }
  0x6d   : > { %3925 = vmatmul.mubr.msk.bf16.gmra.mrb[4].mxu1 %vm555_vm3, %v4693_v19 }
  0x6e   : > { %3928 = vmatprep.mubr.msk.bf16.mxu1 %vm555_vm3, %v4696_v20 }
  0x6f   : > { %4093 = vmatmul.mubr.msk.bf16.gmra.mrb[20].mxu0 %vm555_vm3, %v5113_v37 }
  0x70   : > { %4096 = vmatprep.mubr.msk.bf16.mxu0 %vm555_vm3, %v5120_v57 }
  0x75   : > { %3929 = vmatmul.mubr.msk.bf16.gmra.mrb[8].mxu1 %vm555_vm3, %v4708_v33 }
  0x76   : > { %3932 = vmatprep.mubr.msk.bf16.mxu1 %vm555_vm3, %v4725_v43 }
  0x77   : > { %4097 = vmatmul.mubr.msk.bf16.gmra.mrb[24].mxu0 %vm555_vm3, %v5135_v26 }
  0x78   : > { %4100 = vmatprep.mubr.msk.bf16.mxu0 %vm555_vm3, %v5140_v13 }
  0x7d   : > { %3933 = vmatmul.mubr.msk.bf16.gmra.mrb[12].mxu1 %vm555_vm3, %v4742_v52 }
  0x7e   : > { %3936 = vmatprep.mubr.msk.bf16.mxu1 %vm555_vm3, %v4770_v2 }
  0x7f   : > { %4101 = vmatmul.mubr.msk.bf16.gmra.mrb[28].mxu0 %vm555_vm3, %v5150_v53 }
  0x80   : > { %4104 = vmatprep.mubr.msk.bf16.mxu0 %vm555_vm3, %v5160_v17 }
  0x85   : > { %3937 = vmatmul.mubr.msk.bf16.gmra.mrb[16].mxu1 %vm555_vm3, %v4797_v25 }
  0x86   : > { %3940 = vmatprep.mubr.msk.bf16.mxu1 %vm555_vm3, %v4804_v30 }
  0x87   : > { %4105 = vmatmul.mubr.msk.bf16.gmra.mrb[32].mxu0 %vm555_vm3, %v1961_v36  ;;  %v1054_v36 = vrot.slane %v4905_v23, 1 }
  0x88   : > { %4110 = vmatprep.mubr.msk.bf16.mxu0 %vm555_vm3, %v4941_v22  ;;  %v1030_v22 = vrot.slane %v4679_v11, 1 }
  0x8d   : > { %3941 = vmatmul.mubr.msk.bf16.gmra.mrb[20].mxu1 %vm555_vm3, %v4831_v58 }
  0x8e   : > { %3944 = vmatprep.mubr.msk.bf16.mxu1 %vm555_vm3, %v4859_v27 }
  0x8f   : > { %4111 = vmatmul.mubr.msk.bf16.vlgmr.msra.gmra.mrb[0].mxu0 %vm555_vm3, %v4953_v3  ;;  %v1028_v3 = vrot.slane %v4675_v9, 1 }
  0x90   : > { %4147 = vmatpush3.bf16.msra.mxu0 %v2611_v42  ;;  %4114 = vmatprep.mubr.msk.bf16.mxu0 %vm555_vm3, %v4992_v50  ;;  %v5225_v50 = vsel %vm1026_vm6, %v1030_v22, %v1032_v8  ;;  %v1056_v42 = vrot.slane %v4916_v62, 1 }
  0x91   : > { %4521 = vmatprep.subr.msk.bf16.mxu0 %vm610_vm0, %v5185_v21  ;;  %v5222_v9 = vsel %vm1026_vm6, %v1028_v3, %v1030_v22  ;;  %v1058_v21 = vrot.slane %v4945_v48, 1 }
  0x95   : > { %3945 = vmatmul.mubr.msk.bf16.gmra.mrb[24].mxu1 %vm555_vm3, %v4868_v40 }
  0x96   : > { %3948 = vmatprep.mubr.msk.bf16.mxu1 %vm555_vm3, %v4905_v23 }
  0x97   : > { %4115 = vmatmul.mubr.msk.bf16.gmra.mrb[4].mxu0 %vm555_vm3, %v5003_v1  ;;  %v1029_v1 = vsel %vm1026_vm6, %v1027_v4, %v1028_v3  ;;  %v5333_v4 = vsel %vm1026_vm6, %v1054_v36, %v1056_v42 }
  0x98   : > { %4118 = vmatprep.mubr.msk.bf16.mxu0 %vm555_vm3, %v5025_v32  ;;  %v1353_v32 = vsel %vm610_vm0, %v5073_v61, 0 }
  0x9d   : > { %3949 = vmatmul.mubr.msk.bf16.gmra.mrb[28].mxu1 %vm555_vm3, %v4916_v62 }
  0x9e   : > { %3952 = vmatprep.mubr.msk.bf16.mxu1 %vm555_vm3, %v4945_v48 }
  0x9f   : > { %4119 = vmatmul.mubr.msk.bf16.gmra.mrb[8].mxu0 %vm555_vm3, %v5032_v54  ;;  %v1034_v54 = vrot.slane %v4696_v20, 1 }
  0xa0   : > { %4122 = vmatprep.mubr.msk.bf16.mxu0 %vm555_vm3, %v5050_v31  ;;  %v1036_v31 = vrot.slane %v4708_v33, 1 }
  0xa2   : > { %v5245_v61 = vsel %vm1026_vm6, %v1034_v54, %v1036_v31 }
  0xa5   : > { %3953 = vmatmul.mubr.msk.bf16.gmra.mrb[32].mxu1 %vm555_vm3, %v4851_v15 }
  0xa6   : > { %3958 = vmatprep.mubr.msk.bf16.mxu1 %vm555_vm3, %v1029_v1  ;;  %v5767_v1 = vld [vmem:[#allocation5_spill] sm:$0xff] }
  0xa7   : > { %4123 = vmatmul.mubr.msk.bf16.gmra.mrb[12].mxu0 %vm555_vm3, %v5058_v51  ;;  %v5242_v51 = vsel %vm1026_vm6, %v1032_v8, %v1034_v54  ;;  %v1062_v22 = vrot.slane %v5767_v1, 1  ;;  %v5768_v8 = vld [vmem:[#allocation4_spill] sm:$0xff]  ;;  %v5778_v1 = vld [vmem:[#allocation14_spill] sm:$0xff] }
  0xa8   : > { %4126 = vmatprep.mubr.msk.bf16.mxu0 %vm555_vm3, %v5085_v5  ;;  %v1040_v5 = vrot.slane %v4742_v52, 1 }
  0xaa   : > { %v5274_v47 = vsel %vm1026_vm6, %v1040_v5, %v1042_v24  ;;  %v5771_v24 = vld [vmem:[#allocation8_spill] sm:$0xff] }
  0xab   : > { %v2507_v10 = vrot.slane %v5771_v24, 3 }
  0xad   : > { %3959 = vmatmul.mubr.msk.bf16.vlgmr.msra.gmra.mrb[0].mxu1 %vm555_vm3, %v5222_v9 }
  0xae   : > { %3962 = vmatprep.mubr.msk.bf16.mxu1 %vm555_vm3, %v5225_v50  ;;  %3995 = vmatpush3.bf16.msra.mxu1 %v1353_v32  ;;  %v5769_v32 = vld [vmem:[#allocation3_spill] sm:$0xff] }
  0xaf   : > { %4517 = vmatprep.subr.msk.bf16.mxu1 %vm610_vm0, %v4645_v0  ;;  %4127 = vmatmul.mubr.msk.bf16.gmra.mrb[16].mxu0 %vm555_vm3, %v5090_v46  ;;  %v1038_v0 = vrot.slane %v4725_v43, 1  ;;  %v2503_v54 = vrot.slane %v5769_v32, 3 }
  0xb0   : > { %4130 = vmatprep.mubr.msk.bf16.mxu0 %vm555_vm3, %v5113_v37  ;;  %v1048_v37 = vrot.slane %v4831_v58, 1 }
  0xb1   : > { %v5258_v46 = vsel %vm1026_vm6, %v1036_v31, %v1038_v0  ;;  %v5261_v16 = vsel %vm1026_vm6, %v1038_v0, %v1040_v5  ;;  %v5770_v0 = vld [vmem:[#allocation9_spill] sm:$0xff] }
  0xb2   : > { %v5297_v34 = vsel %vm1026_vm6, %v1046_v60, %v1048_v37  ;;  %v2506_v5 = vrot.slane %v5770_v0, 2 }
  0xb5   : > { %3963 = vmatmul.mubr.msk.bf16.gmra.mrb[4].mxu1 %vm555_vm3, %v5242_v51 }
  0xb6   : > { %3966 = vmatprep.mubr.msk.bf16.mxu1 %vm555_vm3, %v5245_v61 }
  0xb7   : > { %4131 = vmatmul.mubr.msk.bf16.gmra.mrb[20].mxu0 %vm555_vm3, %v5120_v57  ;;  %v2242_v57 = vrot.slane %v5282_v12, 2 }
  0xb8   : > { %4134 = vmatprep.mubr.msk.bf16.mxu0 %vm555_vm3, %v5135_v26  ;;  %v5766_v26 = vrot.slane %v4973_v59, 2 }
  0xbd   : > { %3967 = vmatmul.mubr.msk.bf16.gmra.mrb[8].mxu1 %vm555_vm3, %v5258_v46 }
  0xbe   : > { %3970 = vmatprep.mubr.msk.bf16.mxu1 %vm555_vm3, %v5261_v16 }
  0xbf   : > { %4135 = vmatmul.mubr.msk.bf16.gmra.mrb[24].mxu0 %vm555_vm3, %v5140_v13  ;;  %v2243_v13 = vsel %vm1924_vm4, %v5766_v26, %v2242_v57  ;;  %v5773_v57 = vld [vmem:[#allocation10_spill] sm:$0xff]  ;;  %v2508_v26 = vor.u32 %v2507_v10, %v2506_v5 }
  0xc0   : > { %4138 = vmatprep.mubr.msk.bf16.mxu0 %vm555_vm3, %v5150_v53  ;;  %v5781_v5 = vld [vmem:[#allocation6_spill] sm:$0xff] }
  0xc1   : > { %v2526_v10 = vrot.slane %v5781_v5, 2 }
  0xc5   : > { %3971 = vmatmul.mubr.msk.bf16.gmra.mrb[12].mxu1 %vm555_vm3, %v5274_v47 }
  0xc6   : > { %3974 = vmatprep.mubr.msk.bf16.mxu1 %vm555_vm3, %v5277_v49 }
  0xc7   : > { %4139 = vmatmul.mubr.msk.bf16.gmra.mrb[28].mxu0 %vm555_vm3, %v5160_v17 }
  0xc8   : > { %4142 = vmatprep.mubr.msk.bf16.mxu0 %vm555_vm3, %v4999_v63  ;;  %v1050_v63 = vrot.slane %v4859_v27, 1 }
  0xca   : > { %v5312_v53 = vsel %vm1026_vm6, %v1048_v37, %v1050_v63  ;;  %v5315_v17 = vsel %vm1026_vm6, %v1050_v63, %v1052_v35 }
  0xcd   : > { %3975 = vmatmul.mubr.msk.bf16.gmra.mrb[16].mxu1 %vm555_vm3, %v5294_v45 }
  0xce   : > { %3978 = vmatprep.mubr.msk.bf16.mxu1 %vm555_vm3, %v5297_v34 }
  0xcf   : > { %4143 = vmatmul.mubr.msk.bf16.gmra.mrb[32].mxu0 %vm555_vm3, %v2243_v13 }
  0xd0   : > { %4148 = vmatprep.mubr.msk.bf16.mxu0 %vm555_vm3, %v5028_v28  ;;  %v5330_v28 = vsel %vm1026_vm6, %v1052_v35, %v1054_v36 }
  0xd5   : > { %3979 = vmatmul.mubr.msk.bf16.gmra.mrb[20].mxu1 %vm555_vm3, %v5312_v53 }
  0xd6   : > { %3982 = vmatprep.mubr.msk.bf16.mxu1 %vm555_vm3, %v5315_v17 }
  0xd7   : > { %4149 = vmatmul.mubr.msk.bf16.vlgmr.msra.gmra.mrb[0].mxu0 %vm555_vm3, %v5035_v7  ;;  %v5341_v7 = vrot.slane %v4851_v15, 1 }
  0xd8   : > { %4185 = vmatpush3.bf16.msra.mxu0 %v2919_v14  ;;  %4152 = vmatprep.mubr.msk.bf16.mxu0 %vm555_vm3, %v5053_v29  ;;  %v5348_v29 = vsel %vm1026_vm6, %v1056_v42, %v1058_v21  ;;  %v5775_v14 = vld [vmem:[#allocation11_spill] sm:$0xff]  ;;  %v5776_v42 = vld [vmem:[#allocation2_spill] sm:$0xff] }
  0xd9   : > { %v5352_v3 = vsel %vm1026_vm6, %v1058_v21, %v5341_v7 }
  0xdd   : > { %3983 = vmatmul.mubr.msk.bf16.gmra.mrb[24].mxu1 %vm555_vm3, %v5330_v28 }
  0xde   : > { %3986 = vmatprep.mubr.msk.bf16.mxu1 %vm555_vm3, %v5333_v4 }
  0xdf   : > { %4153 = vmatmul.mubr.msk.bf16.gmra.mrb[4].mxu0 %vm555_vm3, %v5065_v56  ;;  %v2502_v56 = vrot.slane %v5768_v8, 2 }
  0xe0   : > { %4156 = vmatprep.mubr.msk.bf16.mxu0 %vm555_vm3, %v5080_v6  ;;  %v1063_v6 = vsel %vm1026_vm6, %v5341_v7, %v1062_v22  ;;  %v2519_v22 = vrot.slane %v5778_v1, 3 }
  0xe1   : > { %v2504_v31 = vor.u32 %v2503_v54, %v2502_v56  ;;  %v5780_v54 = vld [vmem:[#allocation16_spill] sm:$0xff] }
  0xe3   : > { %v2505_v60 = vsel %vm2466_vm5, %v5115_v39, %v2504_v31  ;;  %v2509_v63 = vsel %vm2466_vm5, %v2504_v31, %v2508_v26  ;;  %v2515_v39 = vrot.slane %v5775_v14, 3 }
  0xe5   : > { %3987 = vmatmul.mubr.msk.bf16.gmra.mrb[28].mxu1 %vm555_vm3, %v5348_v29 }
  0xe6   : > { %3990 = vmatprep.mubr.msk.bf16.mxu1 %vm555_vm3, %v5352_v3 }
  0xe7   : > { %4157 = vmatmul.mubr.msk.bf16.gmra.mrb[8].mxu0 %vm555_vm3, %v5095_v38  ;;  %v5772_v38 = vld [vmem:[#allocation12_spill] sm:$0xff] }
  0xe8   : > { %4160 = vmatprep.mubr.msk.bf16.mxu0 %vm555_vm3, %v5108_v55  ;;  %v2510_v37 = vrot.slane %v5772_v38, 2  ;;  %v2511_v55 = vrot.slane %v5773_v57, 3 }
  0xea   : > { %v2512_v13 = vor.u32 %v2511_v55, %v2510_v37  ;;  %v5782_v37 = vld [vmem:[#allocation15_spill] sm:$0xff] }
  0xeb   : > { %v1637_v55 = vshrl.u32 %v5782_v37, 16 }
  0xec   : > { %v2513_v36 = vsel %vm2466_vm5, %v2508_v26, %v2512_v13  ;;  %v1640_v26 = vshll.u32 %v5782_v37, 16 }
  0xed   : > { %3991 = vmatmul.mubr.msk.bf16.gmra.mrb[32].mxu1 %vm555_vm3, %v1063_v6  ;;  %v2523_v6 = vrot.slane %v5780_v54, 3 }
  0xee   : > { %3996 = vmatprep.mubr.msk.bf16.mxu1 %vm555_vm3, %v5222_v9  ;;  %v5774_v9 = vld [vmem:[#allocation13_spill] sm:$0xff] }
  0xef   : > { %4161 = vmatmul.mubr.msk.bf16.gmra.mrb[12].mxu0 %vm555_vm3, %v5124_v44  ;;  %v2514_v35 = vrot.slane %v5774_v9, 2  ;;  %v5777_v44 = vld [vmem:[#allocation17_spill] sm:$0xff] }
  0xf0   : > { %4164 = vmatprep.mubr.msk.bf16.mxu0 %vm555_vm3, %v2505_v60  ;;  %v2518_v21 = vrot.slane %v5777_v44, 2  ;;  %v2527_v60 = vrot.slane %v4871_v41, 3 }
  0xf2   : > { %v2520_v8 = vor.u32 %v2519_v22, %v2518_v21 }
  0xf5   : > { %3997 = vmatmul.mubr.msk.bf16.vlgmr.msra.gmra.mrb[0].mxu1 %vm555_vm3, %v5225_v50  ;;  %v2516_v50 = vor.u32 %v2515_v39, %v2514_v35  ;;  %v2530_v39 = vrot.slane %v1637_v55, 2 }
  0xf6   : > { %4000 = vmatprep.mubr.msk.bf16.mxu1 %vm555_vm3, %v5242_v51  ;;  %4223 = vmatpush3.bf16.msra.mxu1 %v5776_v42  ;;  %v5779_v51 = vld [vmem:[#allocation18_spill] sm:$0xff] }
  0xf7   : > { %4165 = vmatmul.mubr.msk.bf16.gmra.mrb[16].mxu0 %vm555_vm3, %v2509_v63  ;;  %v2517_v56 = vsel %vm2466_vm5, %v2512_v13, %v2516_v50  ;;  %v2522_v32 = vrot.slane %v5779_v51, 2  ;;  %v2521_v31 = vsel %vm2466_vm5, %v2516_v50, %v2520_v8  ;;  %v2528_v13 = vor.u32 %v2527_v60, %v2526_v10 }
  0xf8   : > { %4168 = vmatprep.mubr.msk.bf16.mxu0 %vm555_vm3, %v2513_v36  ;;  %v2535_v63 = vshrl.u32 %v4973_v59, 16  ;;  %v2531_v36 = vrot.slane %v1640_v26, 3  ;;  %v2544_v50 = vshrl.u32 %v5282_v12, 16  ;;  %v2827_v60 = vrot.slane %v4679_v11, 3 }
  0xf9   : > { %v2832_v11 = vrot.slane %v4708_v33, 3 }
  0xfa   : > { %v2537_v21 = vrot.slane %v2535_v63, 2  ;;  %v1612_v63 = vrot.slane %v5770_v0, 1  ;;  %v2844_v0 = vrot.slane %v4831_v58, 3 }
  0xfd   : > { %4001 = vmatmul.mubr.msk.bf16.gmra.mrb[4].mxu1 %vm555_vm3, %v5245_v61  ;;  %v2524_v61 = vor.u32 %v2523_v6, %v2522_v32 }
  0xfe   : > { %4004 = vmatprep.mubr.msk.bf16.mxu1 %vm555_vm3, %v5258_v46  ;;  %v2538_v46 = vshll.u32 %v4973_v59, 16 }
  0xff   : > { %4169 = vmatmul.mubr.msk.bf16.gmra.mrb[20].mxu0 %vm555_vm3, %v2517_v56  ;;  %v2525_v35 = vsel %vm2466_vm5, %v2520_v8, %v2524_v61  ;;  %v2529_v42 = vsel %vm2466_vm5, %v2524_v61, %v2528_v13  ;;  %v2547_v8 = vshll.u32 %v5282_v12, 16  ;;  %v2828_v61 = vrot.slane %v4693_v19, 3 }
 0x100   : > { %4172 = vmatprep.mubr.msk.bf16.mxu0 %vm555_vm3, %v2521_v31  ;;  %v2540_v22 = vrot.slane %v2538_v46, 3  ;;  %v1613_v46 = vrot.slane %v5771_v24, 2  ;;  %v1617_v24 = vrot.slane %v5773_v57, 2 }
 0x101   : > { %v2549_v6 = vrot.slane %v2547_v8, 3  ;;  %v1625_v8 = vrot.slane %v5778_v1, 2 }
 0x102   : > { %v2541_v56 = vor.u32 %v2540_v22, %v2537_v21  ;;  %v1620_v21 = vrot.slane %v5774_v9, 1  ;;  %v1621_v22 = vrot.slane %v5775_v14, 2  ;;  %v2848_v9 = vrot.slane %v4868_v40, 3 }
 0x103   : > { %v1624_v14 = vrot.slane %v5777_v44, 1  ;;  %v2850_v44 = vrot.slane %v4905_v23, 3 }
 0x105   : > { %4005 = vmatmul.mubr.msk.bf16.gmra.mrb[8].mxu1 %vm555_vm3, %v5261_v16  ;;  %v2532_v16 = vor.u32 %v2531_v36, %v2530_v39  ;;  %v1614_v39 = vor.u32 %v1613_v46, %v1612_v63  ;;  %v5783_v36 = vld [vmem:[#allocation7_spill] sm:$0xff]  ;;  %v2851_v23 = vsel %vm2826_vm7, %v2848_v9, %v2850_v44 }
 0x106   : > { %4008 = vmatprep.mubr.msk.bf16.mxu1 %vm555_vm3, %v5274_v47  ;;  %v2546_v47 = vrot.slane %v2544_v50, 2  ;;  %v1622_v50 = vor.u32 %v1621_v22, %v1620_v21 }
 0x107   : > { %4173 = vmatmul.mubr.msk.bf16.gmra.mrb[24].mxu0 %vm555_vm3, %v2525_v35  ;;  %v2533_v32 = vsel %vm2466_vm5, %v2528_v13, %v2532_v16  ;;  %v2542_v31 = vsel %vm2466_vm5, %v2532_v16, %v2541_v56  ;;  %v2830_v13 = vrot.slane %v4696_v20, 3  ;;  %v2836_v20 = vrot.slane %v4742_v52, 3 }
 0x108   : > { %4176 = vmatprep.mubr.msk.bf16.mxu0 %vm555_vm3, %v2529_v42  ;;  %v2550_v10 = vor.u32 %v2549_v6, %v2546_v47  ;;  %v2840_v52 = vrot.slane %v4797_v25, 3  ;;  %v2842_v25 = vrot.slane %v4804_v30, 3  ;;  %v1615_v42 = vsel %vm1568_vm2, %v5783_v36, %v1614_v39 }
 0x109   : > { %v2831_v19 = vsel %vm2826_vm7, %v2828_v61, %v2830_v13  ;;  %v1629_v47 = vrot.slane %v5780_v54, 2  ;;  %v1632_v54 = vrot.slane %v5781_v5, 1  ;;  %v1646_v5 = vshrl.u32 %v5154_v18, 16 }
 0x10a   : > { %v2843_v16 = vsel %vm2826_vm7, %v2840_v52, %v2842_v25  ;;  %v2845_v30 = vsel %vm2826_vm7, %v2842_v25, %v2844_v0 }
 0x10d   : > { %4009 = vmatmul.mubr.msk.bf16.gmra.mrb[12].mxu1 %vm555_vm3, %v5277_v49  ;;  %v2551_v49 = vsel %vm2466_vm5, %v2541_v56, %v2550_v10  ;;  %v1633_v10 = vrot.slane %v4871_v41, 2  ;;  %v1649_v41 = vshll.u32 %v5154_v18, 16 }
 0x10e   : > { %4012 = vmatprep.mubr.msk.bf16.mxu1 %vm555_vm3, %v5294_v45  ;;  %v2829_v45 = vsel %vm2826_vm7, %v2827_v60, %v2828_v61  ;;  %v1639_v61 = vrot.slane %v1637_v55, 1  ;;  %v2854_v55 = vrot.slane %v4945_v48, 3  ;;  %v2858_v48 = vrot.slane %v5782_v37, 3 }
 0x10f   : > { %4177 = vmatmul.mubr.msk.bf16.gmra.mrb[28].mxu0 %vm555_vm3, %v2533_v32  ;;  %v1628_v32 = vrot.slane %v5779_v51, 1  ;;  %v2852_v51 = vrot.slane %v4916_v62, 3 }
 0x110   : > { %4180 = vmatprep.mubr.msk.bf16.mxu0 %vm555_vm3, %v2542_v31  ;;  %v1626_v31 = vor.u32 %v1625_v8, %v1624_v14 }
 0x111   : > { %v1630_v40 = vor.u32 %v1629_v47, %v1628_v32  ;;  %v2853_v62 = vsel %vm2826_vm7, %v2850_v44, %v2852_v51  ;;  %v5577_v47 = vld [vmem:[%s5715_s3] ss:$0 sm:$0xff] }
 0x112   : > { %v1627_v1 = vsel %vm1568_vm2, %v1622_v50, %v1626_v31 }
 0x113   : > { %v1631_v60 = vsel %vm1568_vm2, %v1626_v31, %v1630_v40 }
 0x115   : > { %4013 = vmatmul.mubr.msk.bf16.gmra.mrb[16].mxu1 %vm555_vm3, %v5297_v34  ;;  %v2833_v34 = vsel %vm2826_vm7, %v2830_v13, %v2832_v11 }
 0x116   : > { %4016 = vmatprep.mubr.msk.bf16.mxu1 %vm555_vm3, %v5312_v53  ;;  %v2834_v53 = vrot.slane %v4725_v43, 3  ;;  %v2838_v43 = vrot.slane %v4770_v2, 3  ;;  %v1340_v2 = vrot.slane %v5154_v18, 1 }
 0x117   : > { %4181 = vmatmul.mubr.msk.bf16.gmra.mrb[32].mxu0 %vm555_vm3, %v2551_v49  ;;  %v1642_v49 = vrot.slane %v1640_v26, 2 }
 0x118   : > { %4186 = vmatprep.mubr.msk.bf16.mxu0 %vm555_vm3, %v2829_v45  ;;  %v2835_v33 = vsel %vm2826_vm7, %v2832_v11, %v2834_v53  ;;  %v2841_v35 = vsel %vm2826_vm7, %v2838_v43, %v2840_v52  ;;  %v1634_v45 = vor.u32 %v1633_v10, %v1632_v54  ;;  %v2856_v11 = vrot.slane %v4851_v15, 3 }
 0x119   : > { %v1643_v13 = vor.u32 %v1642_v49, %v1639_v61  ;;  %v2862_v52 = vrot.slane %v5282_v12, 3 }
 0x11a   : > { %v1635_v26 = vsel %vm1568_vm2, %v1630_v40, %v1634_v45  ;;  %v2857_v18 = vsel %vm2826_vm7, %v2854_v55, %v2856_v11 }
 0x11d   : > { %4017 = vmatmul.mubr.msk.bf16.gmra.mrb[20].mxu1 %vm555_vm3, %v5315_v17  ;;  %v2837_v17 = vsel %vm2826_vm7, %v2834_v53, %v2836_v20  ;;  %v1644_v53 = vsel %vm1568_vm2, %v1634_v45, %v1643_v13 }
 0x11e   : > { %4020 = vmatprep.mubr.msk.bf16.mxu1 %vm555_vm3, %v5330_v28  ;;  %v1338_v28 = vrot.slane %v5782_v37, 1 }
 0x11f   : > { %4187 = vmatmul.mubr.msk.bf16.vlgmr.msra.gmra.mrb[0].mxu0 %vm555_vm3, %v2831_v19  ;;  %v1648_v19 = vrot.slane %v1646_v5, 1 }
 0x120   : > { %4190 = vmatprep.mubr.msk.bf16.mxu0 %vm555_vm3, %v2833_v34  ;;  %v1651_v34 = vrot.slane %v1649_v41, 2 }
 0x125   : > { %4021 = vmatmul.mubr.msk.bf16.gmra.mrb[24].mxu1 %vm555_vm3, %v5333_v4  ;;  %v1339_v4 = vsel %vm1026_vm6, %v5341_v7, %v1338_v28  ;;  %v1341_v7 = vsel %vm1026_vm6, %v1338_v28, %v1340_v2  ;;  %v2859_v28 = vsel %vm2826_vm7, %v2856_v11, %v2858_v48 }
 0x126   : > { %4024 = vmatprep.mubr.msk.bf16.mxu1 %vm555_vm3, %v5348_v29  ;;  %v2839_v29 = vsel %vm2826_vm7, %v2836_v20, %v2838_v43  ;;  %v2855_v20 = vsel %vm2826_vm7, %v2852_v51, %v2854_v55 }
 0x127   : > { %4191 = vmatmul.mubr.msk.bf16.gmra.mrb[4].mxu0 %vm555_vm3, %v2835_v33  ;;  %v1652_v33 = vor.u32 %v1651_v34, %v1648_v19 }
 0x128   : > { %4194 = vmatprep.mubr.msk.bf16.mxu0 %vm555_vm3, %v2837_v17  ;;  %v2860_v17 = vrot.slane %v4973_v59, 3 }
 0x129   : > { %v1653_v15 = vsel %vm1568_vm2, %v1643_v13, %v1652_v33 }
 0x12a   : > { %v2861_v43 = vsel %vm2826_vm7, %v2858_v48, %v2860_v17 }
 0x12d   : > { %4025 = vmatmul.mubr.msk.bf16.gmra.mrb[28].mxu1 %vm555_vm3, %v5352_v3  ;;  %v1616_v3 = vrot.slane %v5772_v38, 1  ;;  %v2846_v38 = vrot.slane %v4859_v27, 3 }
 0x12e   : > { %4028 = vmatprep.mubr.msk.bf16.mxu1 %vm555_vm3, %v1339_v4  ;;  %v2863_v4 = vsel %vm2826_vm7, %v2860_v17, %v2862_v52 }
 0x12f   : > { %4195 = vmatmul.mubr.msk.bf16.gmra.mrb[8].mxu0 %vm555_vm3, %v2839_v29  ;;  %v1618_v58 = vor.u32 %v1617_v24, %v1616_v3  ;;  %v2847_v6 = vsel %vm2826_vm7, %v2844_v0, %v2846_v38  ;;  %v2849_v27 = vsel %vm2826_vm7, %v2846_v38, %v2848_v9 }
 0x130   : > { %4198 = vmatprep.mubr.msk.bf16.mxu0 %vm555_vm3, %v2841_v35 }
 0x131   : > { %v1619_v57 = vsel %vm1568_vm2, %v1614_v39, %v1618_v58  ;;  %v1623_v56 = vsel %vm1568_vm2, %v1618_v58, %v1622_v50  ;;  %v5570_v50 = vld [vmem:[%s5714_s2] ss:$0 sm:$0xff] }
 0x135   : > { %4029 = vmatmul.mubr.msk.bf16.gmra.mrb[32].mxu1 %vm555_vm3, %v1341_v7 }
 0x136   : > { %4054 = vmatprep.mubr.msk.bf16.mxu1 %vm555_vm3, %v1615_v42 }
 0x137   : > { %4199 = vmatmul.mubr.msk.bf16.gmra.mrb[12].mxu0 %vm555_vm3, %v2843_v16 }
 0x138   : > { %4202 = vmatprep.mubr.msk.bf16.mxu0 %vm555_vm3, %v2845_v30 }
 0x13d   : > { %4055 = vmatmul.mubr.msk.bf16.vlgmr.msra.gmra.mrb[20].mxu1 %vm555_vm3, %v1619_v57 }
 0x13e   : > { %4058 = vmatprep.mubr.msk.bf16.mxu1 %vm555_vm3, %v1623_v56 }
 0x13f   : > { %4203 = vmatmul.mubr.msk.bf16.gmra.mrb[16].mxu0 %vm555_vm3, %v2847_v6 }
 0x140   : > { %4206 = vmatprep.mubr.msk.bf16.mxu0 %vm555_vm3, %v2849_v27 }
 0x145   : > { %4059 = vmatmul.mubr.msk.bf16.gmra.mrb[24].mxu1 %vm555_vm3, %v1627_v1 }
 0x146   : > { %4062 = vmatprep.mubr.msk.bf16.mxu1 %vm555_vm3, %v1631_v60 }
 0x147   : > { %4207 = vmatmul.mubr.msk.bf16.gmra.mrb[20].mxu0 %vm555_vm3, %v2851_v23 }
 0x148   : > { %4210 = vmatprep.mubr.msk.bf16.mxu0 %vm555_vm3, %v2853_v62 }
 0x14d   : > { %4063 = vmatmul.mubr.msk.bf16.gmra.mrb[28].mxu1 %vm555_vm3, %v1635_v26 }
 0x14e   : > { %4066 = vmatprep.mubr.msk.bf16.mxu1 %vm555_vm3, %v1644_v53 }
 0x14f   : > { %4211 = vmatmul.mubr.msk.bf16.gmra.mrb[24].mxu0 %vm555_vm3, %v2855_v20 }
 0x150   : > { %4214 = vmatprep.mubr.msk.bf16.mxu0 %vm555_vm3, %v2857_v18 }
 0x155   : > { %4067 = vmatmul.mubr.msk.bf16.gmra.mrb[32].mxu1 %vm555_vm3, %v1653_v15 }
 0x157   : > { %4215 = vmatmul.mubr.msk.bf16.gmra.mrb[28].mxu0 %vm555_vm3, %v2859_v28 }
 0x158   : > { %4218 = vmatprep.mubr.msk.bf16.mxu0 %vm555_vm3, %v2861_v43 }
 0x15f   : > { %4219 = vmatmul.mubr.msk.bf16.gmra.mrb[32].mxu0 %vm555_vm3, %v2863_v4 }
 0x1c8   : > { %v3998_v37 = vpop.f32.mrb[0].mxu1 }
 0x1c9   : > { %v1389_v63 = vpop.f32.mrb[1].mxu1 }
 0x1ca   : > { %v3999_v46 = vpop.f32.mrb[2].mxu1 }
 0x1cb   : > { %v1392_v59 = vpop.f32.mrb[3].mxu1 }
 0x1d0   : > { %v4002_v29 = vpop.f32.mrb[4].mxu1 }
 0x1d1   : > { %v1405_v35 = vpop.f32.mrb[5].mxu1 }
 0x1d2   : > { %v4003_v2 = vpop.f32.mrb[6].mxu1 }
 0x1d3   : > { %v1408_v39 = vpop.f32.mrb[7].mxu1 }
 0x1d8   : > { %v5543_v25 = vpop.f32.mrb[8].mxu1 }
 0x1d9   : > { %v5545_v7 = vpop.f32.mrb[9].mxu1 }
 0x1da   : > { %v5547_v0 = vpop.f32.mrb[10].mxu1 }
 0x1db   : > { %v5549_v3 = vpop.f32.mrb[11].mxu1 }
 0x1e0   : > { %v5551_v12 = vpop.f32.mrb[12].mxu1 }
 0x1e1   : > { %v5553_v24 = vpop.f32.mrb[13].mxu1 }
 0x1e2   : > { %v5555_v36 = vpop.f32.mrb[14].mxu1 }
 0x1e3   : > { %v5557_v42 = vpop.f32.mrb[15].mxu1 }
 0x1e8   : > { %v5559_v21 = vpop.f32.mrb[16].mxu1 }
 0x1e9   : > { %v5561_v22 = vpop.f32.mrb[17].mxu1 }
 0x1ea   : > { %v5563_v16 = vpop.f32.mrb[18].mxu1 }
 0x1eb   : > { %v5565_v30 = vpop.f32.mrb[19].mxu1 }
 0x1f2   : > { %v4188_v58 = vpop.f32.mrb[0].mxu0 }
 0x1f3   : > { %v4224_v38 = vadd.f32 %v4188_v58, %v3998_v37  ;;  %v2955_v57 = vpop.f32.mrb[1].mxu0 }
 0x1f4   : > { %v4225_v9 = vadd.f32 %v2955_v57, %v1389_v63  ;;  %v4189_v14 = vpop.f32.mrb[2].mxu0 }
 0x1f5   : > { %v3143_v8 = vadd.f32 %v4224_v38, %v5570_v50  ;;  %v4226_v56 = vadd.f32 %v4189_v14, %v3999_v46  ;;  %v2958_v32 = vpop.f32.mrb[3].mxu0 }
 0x1f6   : > { %v3141_v6 = vadd.f32 %v4225_v9, %v5570_v50  ;;  %v4227_v27 = vadd.f32 %v2958_v32, %v1392_v59 }
 0x1f7   : > { %v3216_v31 = vmin.f32 %v3143_v8, 0.0  ;;  %v3144_v40 = vadd.f32 %v4226_v56, %v5570_v50  ;;  %v3179_v51 = vmax.f32 %v3143_v8, 0.0 }
 0x1f8   : > { %v3214_v44 = vmin.f32 %v3141_v6, 0.0  ;;  %v3142_v1 = vadd.f32 %v4227_v27, %v5570_v50  ;;  %v3177_v60 = vmax.f32 %v3141_v6, 0.0 }
 0x1f9   : > { %v3258_v54 = vmul.f32 %v5577_v47, %v3216_v31  ;;  %v3217_v10 = vmin.f32 %v3144_v40, 0.0  ;;  %v3180_v45 = vmax.f32 %v3144_v40, 0.0 }
 0x1fa   : > { %v3256_v61 = vmul.f32 %v5577_v47, %v3214_v44  ;;  %v3215_v49 = vmin.f32 %v3142_v1, 0.0  ;;  %v4192_v23 = vpop.f32.mrb[4].mxu0  ;;  %v3178_v26 = vmax.f32 %v3142_v1, 0.0 }
 0x1fb   : > { %v3294_v62 = vadd.f32 %v3258_v54, %v3179_v51  ;;  %v3259_v5 = vmul.f32 %v5577_v47, %v3217_v10  ;;  %v4228_v41 = vadd.f32 %v4192_v23, %v4002_v29  ;;  %v2971_v13 = vpop.f32.mrb[5].mxu0 }
 0x1fc   : > { %v3292_v55 = vadd.f32 %v3256_v61, %v3177_v60  ;;  %v3257_v11 = vmul.f32 %v5577_v47, %v3215_v49  ;;  %v4229_v19 = vadd.f32 %v2971_v13, %v1405_v35  ;;  %v4193_v34 = vpop.f32.mrb[6].mxu0 }
 0x1fd   : > { %3330 = vst [vmem:[%s5586_s14 + $0x10] sm:$0xff] %v3294_v62  ;;  %v3295_v53 = vadd.f32 %v3259_v5, %v3180_v45  ;;  %v3147_v20 = vadd.f32 %v4228_v41, %v5570_v50  ;;  %v4230_v18 = vadd.f32 %v4193_v34, %v4003_v2  ;;  %v2974_v33 = vpop.f32.mrb[7].mxu0 }
 0x1fe   : > { %3328 = vst [vmem:[%s5586_s14] sm:$0xff] %v3292_v55  ;;  %v3293_v48 = vadd.f32 %v3257_v11, %v3178_v26  ;;  %v3145_v15 = vadd.f32 %v4229_v19, %v5570_v50  ;;  %v4231_v17 = vadd.f32 %v2974_v33, %v1408_v39 }
 0x1ff   : > { %3331 = vst [vmem:[%s5586_s14 + $0x18] sm:$0xff] %v3295_v53  ;;  %v3220_v28 = vmin.f32 %v3147_v20, 0.0  ;;  %v3148_v43 = vadd.f32 %v4230_v18, %v5570_v50  ;;  %v3183_v37 = vmax.f32 %v3147_v20, 0.0 }
 0x200   : > { %3329 = vst [vmem:[%s5586_s14 + $0x8] sm:$0xff] %v3293_v48  ;;  %v3218_v52 = vmin.f32 %v3145_v15, 0.0  ;;  %v3146_v4 = vadd.f32 %v4231_v17, %v5570_v50  ;;  %v3181_v59 = vmax.f32 %v3145_v15, 0.0 }
 0x201   : > { %v3262_v63 = vmul.f32 %v5577_v47, %v3220_v28  ;;  %v3221_v46 = vmin.f32 %v3148_v43, 0.0  ;;  %v3184_v58 = vmax.f32 %v3148_v43, 0.0 }
 0x202   : > { %v3260_v29 = vmul.f32 %v5577_v47, %v3218_v52  ;;  %v3219_v35 = vmin.f32 %v3146_v4, 0.0  ;;  %v4196_v2 = vpop.f32.mrb[8].mxu0  ;;  %v3182_v8 = vmax.f32 %v3146_v4, 0.0 }
 0x203   : > { %v3298_v39 = vadd.f32 %v3262_v63, %v3183_v37  ;;  %v3263_v38 = vmul.f32 %v5577_v47, %v3221_v46  ;;  %v4232_v57 = vadd.f32 %v4196_v2, %v5543_v25  ;;  %v2987_v9 = vpop.f32.mrb[9].mxu0 }
 0x204   : > { %v3296_v14 = vadd.f32 %v3260_v29, %v3181_v59  ;;  %v3261_v56 = vmul.f32 %v5577_v47, %v3219_v35  ;;  %v4233_v32 = vadd.f32 %v2987_v9, %v5545_v7  ;;  %v4197_v6 = vpop.f32.mrb[10].mxu0 }
 0x205   : > { %3334 = vst [vmem:[%s5586_s14 + $0x30] sm:$0xff] %v3298_v39  ;;  %v3299_v27 = vadd.f32 %v3263_v38, %v3184_v58  ;;  %v3151_v31 = vadd.f32 %v4232_v57, %v5570_v50  ;;  %v4234_v40 = vadd.f32 %v4197_v6, %v5547_v0  ;;  %v2990_v44 = vpop.f32.mrb[11].mxu0 }
 0x206   : > { %3332 = vst [vmem:[%s5586_s14 + $0x20] sm:$0xff] %v3296_v14  ;;  %v3297_v1 = vadd.f32 %v3261_v56, %v3182_v8  ;;  %v3149_v25 = vadd.f32 %v4233_v32, %v5570_v50  ;;  %v4235_v51 = vadd.f32 %v2990_v44, %v5549_v3 }
 0x207   : > { %3335 = vst [vmem:[%s5586_s14 + $0x38] sm:$0xff] %v3299_v27  ;;  %v3224_v54 = vmin.f32 %v3151_v31, 0.0  ;;  %v3152_v10 = vadd.f32 %v4234_v40, %v5570_v50  ;;  %v3187_v61 = vmax.f32 %v3151_v31, 0.0 }
 0x208   : > { %3333 = vst [vmem:[%s5586_s14 + $0x28] sm:$0xff] %v3297_v1  ;;  %v3222_v7 = vmin.f32 %v3149_v25, 0.0  ;;  %v3150_v60 = vadd.f32 %v4235_v51, %v5570_v50  ;;  %v3185_v23 = vmax.f32 %v3149_v25, 0.0 }
 0x209   : > { %v3266_v49 = vmul.f32 %v5577_v47, %v3224_v54  ;;  %v3225_v0 = vmin.f32 %v3152_v10, 0.0  ;;  %v3188_v41 = vmax.f32 %v3152_v10, 0.0 }
 0x20a   : > { %v3264_v62 = vmul.f32 %v5577_v47, %v3222_v7  ;;  %v3223_v45 = vmin.f32 %v3150_v60, 0.0  ;;  %v4200_v5 = vpop.f32.mrb[12].mxu0  ;;  %v3186_v19 = vmax.f32 %v3150_v60, 0.0 }
 0x20b   : > { %v3302_v3 = vadd.f32 %v3266_v49, %v3187_v61  ;;  %v3267_v13 = vmul.f32 %v5577_v47, %v3225_v0  ;;  %v4236_v55 = vadd.f32 %v4200_v5, %v5551_v12  ;;  %v3003_v26 = vpop.f32.mrb[13].mxu0 }
 0x20c   : > { %v3300_v11 = vadd.f32 %v3264_v62, %v3185_v23  ;;  %v3265_v34 = vmul.f32 %v5577_v47, %v3223_v45  ;;  %v4237_v53 = vadd.f32 %v3003_v26, %v5553_v24  ;;  %v4201_v20 = vpop.f32.mrb[14].mxu0 }
 0x20d   : > { %3338 = vst [vmem:[%s5586_s14 + $0x50] sm:$0xff] %v3302_v3  ;;  %v3303_v18 = vadd.f32 %v3267_v13, %v3188_v41  ;;  %v3155_v33 = vadd.f32 %v4236_v55, %v5570_v50  ;;  %v4238_v48 = vadd.f32 %v4201_v20, %v5555_v36  ;;  %v3006_v15 = vpop.f32.mrb[15].mxu0 }
 0x20e   : > { %3336 = vst [vmem:[%s5586_s14 + $0x40] sm:$0xff] %v3300_v11  ;;  %v3301_v17 = vadd.f32 %v3265_v34, %v3186_v19  ;;  %v3153_v12 = vadd.f32 %v4237_v53, %v5570_v50  ;;  %v4239_v28 = vadd.f32 %v3006_v15, %v5557_v42 }
 0x20f   : > { %3339 = vst [vmem:[%s5586_s14 + $0x58] sm:$0xff] %v3303_v18  ;;  %v3228_v43 = vmin.f32 %v3155_v33, 0.0  ;;  %v3156_v52 = vadd.f32 %v4238_v48, %v5570_v50  ;;  %v3191_v46 = vmax.f32 %v3155_v33, 0.0 }
 0x210   : > { %v4056_v4 = vpop.f32.mrb[20].mxu1  ;;  %3337 = vst [vmem:[%s5586_s14 + $0x48] sm:$0xff] %v3301_v17  ;;  %v3226_v24 = vmin.f32 %v3153_v12, 0.0  ;;  %v3154_v37 = vadd.f32 %v4239_v28, %v5570_v50  ;;  %v3189_v35 = vmax.f32 %v3153_v12, 0.0 }
 0x211   : > { %v1825_v63 = vpop.f32.mrb[21].mxu1  ;;  %v3270_v36 = vmul.f32 %v5577_v47, %v3228_v43  ;;  %v3229_v59 = vmin.f32 %v3156_v52, 0.0  ;;  %v3192_v57 = vmax.f32 %v3156_v52, 0.0 }
 0x212   : > { %v4057_v29 = vpop.f32.mrb[22].mxu1  ;;  %v3268_v2 = vmul.f32 %v5577_v47, %v3226_v24  ;;  %v3227_v42 = vmin.f32 %v3154_v37, 0.0  ;;  %v4204_v39 = vpop.f32.mrb[16].mxu0  ;;  %v3190_v32 = vmax.f32 %v3154_v37, 0.0 }
 0x213   : > { %v1828_v58 = vpop.f32.mrb[23].mxu1  ;;  %v3306_v38 = vadd.f32 %v3270_v36, %v3191_v46  ;;  %v3271_v9 = vmul.f32 %v5577_v47, %v3229_v59  ;;  %v4240_v14 = vadd.f32 %v4204_v39, %v5559_v21  ;;  %v3019_v8 = vpop.f32.mrb[17].mxu0 }
 0x214   : > { %v3304_v56 = vadd.f32 %v3268_v2, %v3189_v35  ;;  %v3269_v6 = vmul.f32 %v5577_v47, %v3227_v42  ;;  %v4241_v27 = vadd.f32 %v3019_v8, %v5561_v22  ;;  %v4205_v31 = vpop.f32.mrb[18].mxu0 }
 0x215   : > { %3342 = vst [vmem:[%s5586_s14 + $0x70] sm:$0xff] %v3306_v38  ;;  %v3307_v40 = vadd.f32 %v3271_v9, %v3192_v57  ;;  %v3159_v44 = vadd.f32 %v4240_v14, %v5570_v50  ;;  %v4242_v1 = vadd.f32 %v4205_v31, %v5563_v16  ;;  %v3022_v25 = vpop.f32.mrb[19].mxu0 }
 0x216   : > { %3340 = vst [vmem:[%s5586_s14 + $0x60] sm:$0xff] %v3304_v56  ;;  %v3305_v51 = vadd.f32 %v3269_v6, %v3190_v32  ;;  %v3157_v21 = vadd.f32 %v4241_v27, %v5570_v50  ;;  %v4243_v54 = vadd.f32 %v3022_v25, %v5565_v30 }
 0x217   : > { %3343 = vst [vmem:[%s5586_s14 + $0x78] sm:$0xff] %v3307_v40  ;;  %v3232_v10 = vmin.f32 %v3159_v44, 0.0  ;;  %v3160_v7 = vadd.f32 %v4242_v1, %v5570_v50  ;;  %v3195_v0 = vmax.f32 %v3159_v44, 0.0 }
 0x218   : > { %v4060_v60 = vpop.f32.mrb[24].mxu1  ;;  %3341 = vst [vmem:[%s5586_s14 + $0x68] sm:$0xff] %v3305_v51  ;;  %v3230_v22 = vmin.f32 %v3157_v21, 0.0  ;;  %v3158_v61 = vadd.f32 %v4243_v54, %v5570_v50  ;;  %v3193_v45 = vmax.f32 %v3157_v21, 0.0 }
 0x219   : > { %v1841_v49 = vpop.f32.mrb[25].mxu1  ;;  %v3274_v16 = vmul.f32 %v5577_v47, %v3232_v10  ;;  %v3233_v23 = vmin.f32 %v3160_v7, 0.0  ;;  %v3196_v55 = vmax.f32 %v3160_v7, 0.0 }
 0x21a   : > { %v4061_v62 = vpop.f32.mrb[26].mxu1  ;;  %v3272_v5 = vmul.f32 %v5577_v47, %v3230_v22  ;;  %v3231_v30 = vmin.f32 %v3158_v61, 0.0  ;;  %v4208_v3 = vpop.f32.mrb[20].mxu0  ;;  %v3194_v53 = vmax.f32 %v3158_v61, 0.0 }
 0x21b   : > { %v1844_v41 = vpop.f32.mrb[27].mxu1  ;;  %v3310_v13 = vadd.f32 %v3274_v16, %v3195_v0  ;;  %v3275_v26 = vmul.f32 %v5577_v47, %v3233_v23  ;;  %v4244_v11 = vadd.f32 %v4208_v3, %v4056_v4  ;;  %v3035_v19 = vpop.f32.mrb[21].mxu0 }
 0x21c   : > { %v3308_v34 = vadd.f32 %v3272_v5, %v3193_v45  ;;  %v3273_v20 = vmul.f32 %v5577_v47, %v3231_v30  ;;  %v4245_v18 = vadd.f32 %v3035_v19, %v1825_v63  ;;  %v4209_v33 = vpop.f32.mrb[22].mxu0 }
 0x21d   : > { %3346 = vst [vmem:[%s5586_s14 + $0x90] sm:$0xff] %v3310_v13  ;;  %v3311_v48 = vadd.f32 %v3275_v26, %v3196_v55  ;;  %v3163_v15 = vadd.f32 %v4244_v11, %v5570_v50  ;;  %v4246_v17 = vadd.f32 %v4209_v33, %v4057_v29  ;;  %v3038_v12 = vpop.f32.mrb[23].mxu0 }
 0x21e   : > { %3344 = vst [vmem:[%s5586_s14 + $0x80] sm:$0xff] %v3308_v34  ;;  %v3309_v28 = vadd.f32 %v3273_v20, %v3194_v53  ;;  %v3161_v43 = vadd.f32 %v4245_v18, %v5570_v50  ;;  %v4247_v52 = vadd.f32 %v3038_v12, %v1828_v58 }
 0x21f   : > { %3347 = vst [vmem:[%s5586_s14 + $0x98] sm:$0xff] %v3311_v48  ;;  %v3236_v4 = vmin.f32 %v3163_v15, 0.0  ;;  %v3164_v24 = vadd.f32 %v4246_v17, %v5570_v50  ;;  %v3199_v59 = vmax.f32 %v3163_v15, 0.0 }
 0x220   : > { %v4064_v37 = vpop.f32.mrb[28].mxu1  ;;  %3345 = vst [vmem:[%s5586_s14 + $0x88] sm:$0xff] %v3309_v28  ;;  %v3234_v46 = vmin.f32 %v3161_v43, 0.0  ;;  %v3162_v63 = vadd.f32 %v4247_v52, %v5570_v50  ;;  %v3197_v42 = vmax.f32 %v3161_v43, 0.0 }
 0x221   : > { %v1857_v36 = vpop.f32.mrb[29].mxu1  ;;  %v3278_v35 = vmul.f32 %v5577_v47, %v3236_v4  ;;  %v3237_v29 = vmin.f32 %v3164_v24, 0.0  ;;  %v3200_v14 = vmax.f32 %v3164_v24, 0.0 }
 0x222   : > { %v4065_v2 = vpop.f32.mrb[30].mxu1  ;;  %v3276_v39 = vmul.f32 %v5577_v47, %v3234_v46  ;;  %v3235_v58 = vmin.f32 %v3162_v63, 0.0  ;;  %v4212_v38 = vpop.f32.mrb[24].mxu0  ;;  %v3198_v27 = vmax.f32 %v3162_v63, 0.0 }
 0x223   : > { %v1860_v57 = vpop.f32.mrb[31].mxu1  ;;  %v3314_v9 = vadd.f32 %v3278_v35, %v3199_v59  ;;  %v3279_v8 = vmul.f32 %v5577_v47, %v3237_v29  ;;  %v4248_v56 = vadd.f32 %v4212_v38, %v4060_v60  ;;  %v3051_v32 = vpop.f32.mrb[25].mxu0 }
 0x224   : > { %v3312_v6 = vadd.f32 %v3276_v39, %v3197_v42  ;;  %v3277_v31 = vmul.f32 %v5577_v47, %v3235_v58  ;;  %v4249_v40 = vadd.f32 %v3051_v32, %v1841_v49  ;;  %v4213_v44 = vpop.f32.mrb[26].mxu0 }
 0x225   : > { %3350 = vst [vmem:[%s5586_s14 + $0xb0] sm:$0xff] %v3314_v9  ;;  %v3315_v1 = vadd.f32 %v3279_v8, %v3200_v14  ;;  %v3167_v25 = vadd.f32 %v4248_v56, %v5570_v50  ;;  %v4250_v51 = vadd.f32 %v4213_v44, %v4061_v62  ;;  %v3054_v21 = vpop.f32.mrb[27].mxu0 }
 0x226   : > { %3348 = vst [vmem:[%s5586_s14 + $0xa0] sm:$0xff] %v3312_v6  ;;  %v3313_v54 = vadd.f32 %v3277_v31, %v3198_v27  ;;  %v3165_v10 = vadd.f32 %v4249_v40, %v5570_v50  ;;  %v4251_v7 = vadd.f32 %v3054_v21, %v1844_v41 }
 0x227   : > { %3351 = vst [vmem:[%s5586_s14 + $0xb8] sm:$0xff] %v3315_v1  ;;  %v3240_v60 = vmin.f32 %v3167_v25, 0.0  ;;  %v3168_v22 = vadd.f32 %v4250_v51, %v5570_v50  ;;  %v3203_v23 = vmax.f32 %v3167_v25, 0.0 }
 0x228   : > { %v4068_v61 = vpop.f32.mrb[32].mxu1  ;;  %3349 = vst [vmem:[%s5586_s14 + $0xa8] sm:$0xff] %v3313_v54  ;;  %v3238_v0 = vmin.f32 %v3165_v10, 0.0  ;;  %v3166_v49 = vadd.f32 %v4251_v7, %v5570_v50  ;;  %v3201_v30 = vmax.f32 %v3165_v10, 0.0 }
 0x229   : > { %v1873_v16 = vpop.f32.mrb[33].mxu1  ;;  %v3282_v45 = vmul.f32 %v5577_v47, %v3240_v60  ;;  %v3241_v62 = vmin.f32 %v3168_v22, 0.0  ;;  %v3204_v11 = vmax.f32 %v3168_v22, 0.0 }
 0x22a   : > { %v4069_v5 = vpop.f32.mrb[34].mxu1  ;;  %v3280_v3 = vmul.f32 %v5577_v47, %v3238_v0  ;;  %v3239_v41 = vmin.f32 %v3166_v49, 0.0  ;;  %v4216_v13 = vpop.f32.mrb[28].mxu0  ;;  %v3202_v18 = vmax.f32 %v3166_v49, 0.0 }
 0x22b   : > { %v1876_v55 = vpop.f32.mrb[35].mxu1  ;;  %v3318_v26 = vadd.f32 %v3282_v45, %v3203_v23  ;;  %v3283_v19 = vmul.f32 %v5577_v47, %v3241_v62  ;;  %v4252_v34 = vadd.f32 %v4216_v13, %v4064_v37  ;;  %v3067_v53 = vpop.f32.mrb[29].mxu0 }
 0x22c   : > { %v3316_v20 = vadd.f32 %v3280_v3, %v3201_v30  ;;  %v3281_v33 = vmul.f32 %v5577_v47, %v3239_v41  ;;  %v4253_v48 = vadd.f32 %v3067_v53, %v1857_v36  ;;  %v4217_v15 = vpop.f32.mrb[30].mxu0 }
 0x22d   : > { %3354 = vst [vmem:[%s5586_s14 + $0xd0] sm:$0xff] %v3318_v26  ;;  %v3319_v17 = vadd.f32 %v3283_v19, %v3204_v11  ;;  %v3171_v12 = vadd.f32 %v4252_v34, %v5570_v50  ;;  %v4254_v28 = vadd.f32 %v4217_v15, %v4065_v2  ;;  %v3070_v43 = vpop.f32.mrb[31].mxu0 }
 0x22e   : > { %3352 = vst [vmem:[%s5586_s14 + $0xc0] sm:$0xff] %v3316_v20  ;;  %v3317_v52 = vadd.f32 %v3281_v33, %v3202_v18  ;;  %v3169_v4 = vadd.f32 %v4253_v48, %v5570_v50  ;;  %v4255_v24 = vadd.f32 %v3070_v43, %v1860_v57 }
 0x22f   : > { %3355 = vst [vmem:[%s5586_s14 + $0xd8] sm:$0xff] %v3319_v17  ;;  %v3244_v37 = vmin.f32 %v3171_v12, 0.0  ;;  %v3172_v46 = vadd.f32 %v4254_v28, %v5570_v50  ;;  %v3207_v59 = vmax.f32 %v3171_v12, 0.0 }
 0x230   : > { %3353 = vst [vmem:[%s5586_s14 + $0xc8] sm:$0xff] %v3317_v52  ;;  %v3242_v63 = vmin.f32 %v3169_v4, 0.0  ;;  %v3170_v36 = vadd.f32 %v4255_v24, %v5570_v50  ;;  %v3205_v2 = vmax.f32 %v3169_v4, 0.0 }
 0x231   : > { %v3286_v35 = vmul.f32 %v5577_v47, %v3244_v37  ;;  %v3245_v29 = vmin.f32 %v3172_v46, 0.0  ;;  %v3208_v57 = vmax.f32 %v3172_v46, 0.0 }
 0x232   : > { %v3284_v42 = vmul.f32 %v5577_v47, %v3242_v63  ;;  %v3243_v39 = vmin.f32 %v3170_v36, 0.0  ;;  %v4220_v58 = vpop.f32.mrb[32].mxu0  ;;  %v3206_v32 = vmax.f32 %v3170_v36, 0.0 }
 0x233   : > { %v3322_v38 = vadd.f32 %v3286_v35, %v3207_v59  ;;  %v3287_v9 = vmul.f32 %v5577_v47, %v3245_v29  ;;  %v4256_v14 = vadd.f32 %v4220_v58, %v4068_v61  ;;  %v3083_v8 = vpop.f32.mrb[33].mxu0 }
 0x234   : > { %v3320_v56 = vadd.f32 %v3284_v42, %v3205_v2  ;;  %v3285_v6 = vmul.f32 %v5577_v47, %v3243_v39  ;;  %v4257_v27 = vadd.f32 %v3083_v8, %v1873_v16  ;;  %v4221_v31 = vpop.f32.mrb[34].mxu0 }
 0x235   : > { %3358 = vst [vmem:[%s5586_s14 + $0xf0] sm:$0xff] %v3322_v38  ;;  %v3323_v40 = vadd.f32 %v3287_v9, %v3208_v57  ;;  %v3175_v44 = vadd.f32 %v4256_v14, %v5570_v50  ;;  %v4258_v1 = vadd.f32 %v4221_v31, %v4069_v5  ;;  %v3086_v25 = vpop.f32.mrb[35].mxu0 }
 0x236   : > { %3356 = vst [vmem:[%s5586_s14 + $0xe0] sm:$0xff] %v3320_v56  ;;  %v3321_v51 = vadd.f32 %v3285_v6, %v3206_v32  ;;  %v3173_v21 = vadd.f32 %v4257_v27, %v5570_v50  ;;  %v4259_v54 = vadd.f32 %v3086_v25, %v1876_v55 }
 0x237   : > { %3359 = vst [vmem:[%s5586_s14 + $0xf8] sm:$0xff] %v3323_v40  ;;  %v3248_v10 = vmin.f32 %v3175_v44, 0.0  ;;  %v3176_v7 = vadd.f32 %v4258_v1, %v5570_v50  ;;  %v3211_v61 = vmax.f32 %v3175_v44, 0.0 }
 0x238   : > { %3357 = vst [vmem:[%s5586_s14 + $0xe8] sm:$0xff] %v3321_v51  ;;  %v3246_v60 = vmin.f32 %v3173_v21, 0.0  ;;  %v3174_v22 = vadd.f32 %v4259_v54, %v5570_v50  ;;  %v3209_v16 = vmax.f32 %v3173_v21, 0.0 }
 0x239   : > { %v3290_v0 = vmul.f32 %v5577_v47, %v3248_v10  ;;  %v3249_v49 = vmin.f32 %v3176_v7, 0.0  ;;  %v3212_v5 = vmax.f32 %v3176_v7, 0.0 }
 0x23a   : > { %v3288_v23 = vmul.f32 %v5577_v47, %v3246_v60  ;;  %v3247_v45 = vmin.f32 %v3174_v22, 0.0  ;;  %v3210_v41 = vmax.f32 %v3174_v22, 0.0 }
 0x23b   : > { %v3326_v62 = vadd.f32 %v3290_v0, %v3211_v61  ;;  %v3291_v30 = vmul.f32 %v5577_v47, %v3249_v49 }
 0x23c   : > { %v3324_v3 = vadd.f32 %v3288_v23, %v3209_v16  ;;  %v3289_v13 = vmul.f32 %v5577_v47, %v3247_v45 }
 0x23d   : > { %3362 = vst [vmem:[%s5586_s14 + $0x110] sm:$0xff] %v3326_v62  ;;  %v3327_v50 = vadd.f32 %v3291_v30, %v3212_v5 }
 0x23e   : > { %3360 = vst [vmem:[%s5586_s14 + $0x100] sm:$0xff] %v3324_v3  ;;  %v3325_v55 = vadd.f32 %v3289_v13, %v3210_v41 }
 0x23f   : > { %3363 = vst [vmem:[%s5586_s14 + $0x118] sm:$0xff] %v3327_v50 }
 0x240   : > { %3361 = vst [vmem:[%s5586_s14 + $0x108] sm:$0xff] %v3325_v55 }
 0x241 PF: > { %s14_s17 = sadd.s32 1, %s4597_s17   ;;  %s5784_s15 = smov %s4593_s16 }
 0x242   : > { %p11_p5 = scmp.ge.s32.totalorder %s14_s17, 4   ;;  %s5785_s16 = smov %s5787_s18 }
 0x244   :  { %13 = sbr.rel (!%p11_p5) target bundleno = 2 (0x2), region = 75 }

</bundles_post_ra>
